<compile_context>
chip_gen: v7x
topology: tpu7x:2x2x1
jax: 0.10.0
libtpu: 0.0.40
codegen_flags: <defaults>
</compile_context>

<pallas_src>
import functools
import math

import jax
import jax.numpy as jnp
import numpy as np
from jax.experimental import pallas as pl
from jax.experimental.pallas import tpu as pltpu

_LANE = 128


def _round_up(x, m):
    return ((x + m - 1) // m) * m


# ---------------------------------------------------------------------------
# Fused kernel
# ---------------------------------------------------------------------------
def _fused_lsgprm_kernel(*refs, nlayer, K):
    """Whole LSGPRM eval forward in one kernel invocation.

    refs = (att_ref  : SMEM f32[nlayer*(K+1)]           (flattened GPR coefficients)
            x_ref    : VMEM bf16[Np, Fp]                 (zero-padded node features)
            adj_ref  : VMEM bf16[Np, Np]                 (zero-padded normalized adj)
            w_0, b_0, ..., w_nlayer, b_nlayer            (bf16 weights / f32 biases;
                                                          last bias = -1e30 in padded cols)
            o_ref    : VMEM f32[Np, Cp])
    """
    att_ref, x_ref, adj_ref = refs[0], refs[1], refs[2]
    o_ref = refs[-1]
    wb_refs = refs[3:-1]
    w_refs = wb_refs[0::2]
    b_refs = wb_refs[1::2]

    adj = adj_ref[...]                      # bf16, resident in VMEM, loaded once
    h_in = x_ref[...]                       # bf16 [Np, Fp]

    for i in range(nlayer):                 # nlayer is static -> unrolled
        # Hoist the K+1 scalar coefficient reads out of the propagation loop.
        coeff = [att_ref[i * (K + 1) + j] for j in range(K + 1)]

        w = w_refs[i][...]                  # bf16 [din_p, dout_p]
        b = b_refs[i][...]                  # f32  [1, dout_p]
        h = jnp.dot(h_in, w, preferred_element_type=jnp.float32) + b    # f32
        aggx = h * coeff[0]
        hb = h.astype(jnp.bfloat16)
        for j in range(1, K + 1):           # K is static -> unrolled
            h = jnp.dot(adj, hb, preferred_element_type=jnp.float32)    # MXU, f32 acc
            aggx = aggx + h * coeff[j]
            hb = h.astype(jnp.bfloat16)
        h_in = jnp.maximum(aggx, 0.0).astype(jnp.bfloat16)

    # Final classifier + log_softmax.  Padded class columns carry a -1e30 bias,
    # so they vanish from the softmax without any in-kernel masking.
    logits = jnp.dot(h_in, w_refs[nlayer][...],
                     preferred_element_type=jnp.float32) + b_refs[nlayer][...]
    m = jnp.max(logits, axis=1, keepdims=True)
    z = logits - m
    lse = jnp.log(jnp.sum(jnp.exp(z), axis=1, keepdims=True))
    o_ref[...] = z - lse


# ---------------------------------------------------------------------------
# Wrapper
# ---------------------------------------------------------------------------
def lsgprm_forward(x, weights, biases, att, adj, K):
    """Eval-mode LSGPRM forward.

    x: f32[N, F]; weights[i]: f32[din_i, dout_i] (pre-transposed vs torch Linear);
    biases[i]: f32[1, dout_i]; att: f32[nlayer, K+1]; adj: f32[N, N].
    Returns log_softmax logits f32[N, n_classes].
    """
    nlayer = att.shape[0]
    assert len(weights) == nlayer + 1 and len(biases) == nlayer + 1
    N, F = x.shape
    n_classes = weights[-1].shape[1]

    # Lane-dense padding: round every matmul dim up to a multiple of 128.
    Np = _round_up(N, _LANE)
    dims = [F] + [w.shape[1] for w in weights]
    dims_p = [_round_up(d, _LANE) for d in dims]

    x_p = (jnp.zeros((Np, dims_p[0]), jnp.float32)
           .at[:N, :F].set(x).astype(jnp.bfloat16))
    adj_p = (jnp.zeros((Np, Np), jnp.float32)
             .at[:N, :N].set(adj).astype(jnp.bfloat16))

    w_p, b_p = [], []
    for i, (w, b) in enumerate(zip(weights, biases)):
        wp = (jnp.zeros((dims_p[i], dims_p[i + 1]), jnp.float32)
              .at[:dims[i], :dims[i + 1]].set(w).astype(jnp.bfloat16))
        # Last layer: padded class columns get -1e30 so log_softmax ignores them.
        pad_fill = -1e30 if i == nlayer else 0.0
        bp = (jnp.full((1, dims_p[i + 1]), pad_fill, jnp.float32)
              .at[:, :dims[i + 1]].set(b))
        w_p.append(wp)
        b_p.append(bp)

    att_flat = att.astype(jnp.float32).reshape(-1)   # 1-D SMEM (minimal padding)

    # Explicit VMEM budget (operands + f32 intermediates), with headroom, capped
    # below the physical VMEM of the current generation.
    def _nbytes(a):
        return int(np.prod(a.shape)) * jnp.dtype(a.dtype).itemsize

    est = _nbytes(adj_p) + _nbytes(x_p) + sum(map(_nbytes, w_p)) + sum(map(_nbytes, b_p))
    est += Np * max(dims_p) * 4 * 6                  # f32 h / aggx / logits temporaries
    est += Np * dims_p[-1] * 4                       # output
    try:
        vmem_cap = pltpu.get_tpu_info().vmem_capacity_bytes
    except Exception:
        vmem_cap = 64 << 20
    vmem_limit = min(max(int(1.5 * est) + (8 << 20), 32 << 20), int(0.85 * vmem_cap))

    vspec = pl.BlockSpec(memory_space=pltpu.MemorySpace.VMEM)
    sspec = pl.BlockSpec(memory_space=pltpu.MemorySpace.SMEM)
    in_specs = [sspec, vspec, vspec]
    args = [att_flat, x_p, adj_p]
    for wp, bp in zip(w_p, b_p):
        in_specs += [vspec, vspec]
        args += [wp, bp]

    out_p = pl.pallas_call(
        functools.partial(_fused_lsgprm_kernel, nlayer=nlayer, K=K),
        out_shape=jax.ShapeDtypeStruct((Np, dims_p[-1]), jnp.float32),
        in_specs=in_specs,
        out_specs=vspec,
        compiler_params=pltpu.CompilerParams(vmem_limit_bytes=vmem_limit),
    )(*args)

    return out_p[:N, :n_classes]


# ---------------------------------------------------------------------------
# Pure-JAX f32 reference (for validation)
# ---------------------------------------------------------------------------
def lsgprm_reference(x, weights, biases, att, adj, K):
    nlayer = att.shape[0]
    h = x
    for i in range(nlayer):
        h = h @ weights[i] + biases[i]
        aggx = h * att[i, 0]
        for j in range(1, K + 1):
            h = adj @ h
            aggx = aggx + h * att[i, j]
        h = jnp.maximum(aggx, 0.0)
    logits = h @ weights[-1] + biases[-1]
    return jax.nn.log_softmax(logits, axis=1)


# ---------------------------------------------------------------------------
# Deterministic parameter / graph construction
# ---------------------------------------------------------------------------
def build_graph(key, N):
    """Random undirected graph + self loops; return dense normalized adjacency."""
    n_rand_edges = 3 * N
    src = jax.random.randint(key, (n_rand_edges,), 0, N)
    dst = jax.random.randint(jax.random.fold_in(key, 1), (n_rand_edges,), 0, N)
    A = np.zeros((N, N), dtype=np.float32)
    src_np, dst_np = np.asarray(src), np.asarray(dst)
    A[src_np, dst_np] = 1.0
    A[dst_np, src_np] = 1.0          # to_undirected
    np.fill_diagonal(A, 1.0)         # add_remaining_self_loops
    deg = A.sum(axis=0)
    d_inv_sqrt = deg ** (-0.5)
    A_hat = d_inv_sqrt[:, None] * A * d_inv_sqrt[None, :]
    return jnp.asarray(A_hat, dtype=jnp.float32)


def init_linear(key, fan_in, fan_out):
    """torch.nn.Linear-style uniform init (bound = 1/sqrt(fan_in))."""
    bound = 1.0 / math.sqrt(fan_in)
    k_w, k_b = jax.random.split(key)
    w = jax.random.uniform(k_w, (fan_in, fan_out), jnp.float32, -bound, bound)
    b = jax.random.uniform(k_b, (1, fan_out), jnp.float32, -bound, bound)
    return w, b


def build_att(alpha, K, nlayer):
    t = alpha * (1.0 - alpha) ** np.arange(0, K + 1, dtype=np.float32)
    t[-1] = (1.0 - alpha) ** K
    return jnp.asarray(np.tile(t[None, :], (nlayer, 1)), dtype=jnp.float32)


# ---------------------------------------------------------------------------
if __name__ == "__main__":
    # Small, forward-consistent shapes.
    N = 16            # num_nodes
    F_IN = 8          # num_features
    HIDDEN = 32       # args.hidden
    NLAYER = 2        # args.nlayer
    K = 4             # args.K
    ALPHA = 0.1       # args.alpha
    OUT_CLASSES = 4   # dataset.num_classes (> 2)

    key = jax.random.PRNGKey(0)
    k_x, k_g, k_p = jax.random.split(key, 3)

    # Node features
    x = jax.random.normal(k_x, (N, F_IN), dtype=jnp.float32)

    # Graph (dense normalized adjacency)
    adj = build_graph(k_g, N)

    # Linear layers: [F_IN->HIDDEN], (NLAYER-1) x [HIDDEN->HIDDEN], [HIDDEN->OUT]
    dims = [F_IN] + [HIDDEN] * NLAYER + [OUT_CLASSES]
    weights, biases = [], []
    for i in range(NLAYER + 1):
        w, b = init_linear(jax.random.fold_in(k_p, i), dims[i], dims[i + 1])
        weights.append(w)
        biases.append(b)

    # GPR coefficients
    att = build_att(ALPHA, K, NLAYER)

    out = lsgprm_forward(x, weights, biases, att, adj, K)
    out = jax.block_until_ready(out)
    out_np = np.asarray(out)

    # sanity: shape + log_softmax rows sum to 1 in prob space
    assert out.shape == (N, OUT_CLASSES)
    assert np.allclose(np.exp(out_np).sum(axis=1), 1.0, atol=1e-4)
    assert np.all(np.isfinite(out_np))

    # validate bf16 kernel against the pure-JAX f32 reference
    ref = np.asarray(lsgprm_reference(x, weights, biases, att, adj, K))
    assert np.allclose(out_np, ref, atol=1.5e-1, rtol=2e-2), \
        f"max abs diff {np.max(np.abs(out_np - ref))}"

    print("KERNEL_OK")
</pallas_src>

<mosaic_0001>
module attributes {stable_mosaic.version = 11 : i64} {
  func.func @_fused_lsgprm_kernel(%arg0: memref<10xf32, #tpu.memory_space<smem>>, %arg1: memref<128x128xbf16, #tpu.memory_space<vmem>>, %arg2: memref<128x128xbf16, #tpu.memory_space<vmem>>, %arg3: memref<128x128xbf16, #tpu.memory_space<vmem>>, %arg4: memref<1x128xf32, #tpu.memory_space<vmem>>, %arg5: memref<128x128xbf16, #tpu.memory_space<vmem>>, %arg6: memref<1x128xf32, #tpu.memory_space<vmem>>, %arg7: memref<128x128xbf16, #tpu.memory_space<vmem>>, %arg8: memref<1x128xf32, #tpu.memory_space<vmem>>, %arg9: memref<128x128xf32, #tpu.memory_space<vmem>>) attributes {dimension_semantics = [], scalar_prefetch = 0 : i64, scratch_operands = 0 : i64, tpu.core_type = #tpu.core_type<tc>} {
    %c0 = arith.constant 0 : index
    %c0_0 = arith.constant 0 : index
    %0 = vector.load %arg2[%c0, %c0_0] : memref<128x128xbf16, #tpu.memory_space<vmem>>, vector<128x128xbf16>
    %c0_1 = arith.constant 0 : index
    %c0_2 = arith.constant 0 : index
    %1 = vector.load %arg1[%c0_1, %c0_2] : memref<128x128xbf16, #tpu.memory_space<vmem>>, vector<128x128xbf16>
    %c0_3 = arith.constant 0 : index
    %2 = memref.load %arg0[%c0_3] : memref<10xf32, #tpu.memory_space<smem>>
    %c1 = arith.constant 1 : index
    %3 = memref.load %arg0[%c1] : memref<10xf32, #tpu.memory_space<smem>>
    %c2 = arith.constant 2 : index
    %4 = memref.load %arg0[%c2] : memref<10xf32, #tpu.memory_space<smem>>
    %c3 = arith.constant 3 : index
    %5 = memref.load %arg0[%c3] : memref<10xf32, #tpu.memory_space<smem>>
    %c4 = arith.constant 4 : index
    %6 = memref.load %arg0[%c4] : memref<10xf32, #tpu.memory_space<smem>>
    %c0_4 = arith.constant 0 : index
    %c0_5 = arith.constant 0 : index
    %7 = vector.load %arg3[%c0_4, %c0_5] : memref<128x128xbf16, #tpu.memory_space<vmem>>, vector<128x128xbf16>
    %c0_6 = arith.constant 0 : index
    %c0_7 = arith.constant 0 : index
    %8 = vector.load %arg4[%c0_6, %c0_7] : memref<1x128xf32, #tpu.memory_space<vmem>>, vector<1x128xf32>
    %cst = arith.constant dense<0.000000e+00> : vector<128x128xf32>
    %9 = tpu.matmul %1, %7, %cst {dimension_numbers = #tpu.dot_dimension_numbers<[1], [0], [0], [1], [0, 0, 1, 1], [], []>} : vector<128x128xbf16>, vector<128x128xbf16>, vector<128x128xf32> -> vector<128x128xf32>
    %10 = vector.broadcast %8 : vector<1x128xf32> to vector<128x128xf32>
    %11 = arith.addf %9, %10 : vector<128x128xf32>
    %12 = vector.broadcast %2 : f32 to vector<128x128xf32>
    %13 = arith.mulf %11, %12 : vector<128x128xf32>
    %14 = arith.truncf %11 : vector<128x128xf32> to vector<128x128xbf16>
    %cst_8 = arith.constant dense<0.000000e+00> : vector<128x128xf32>
    %15 = tpu.matmul %0, %14, %cst_8 {dimension_numbers = #tpu.dot_dimension_numbers<[1], [0], [0], [1], [0, 0, 1, 1], [], []>} : vector<128x128xbf16>, vector<128x128xbf16>, vector<128x128xf32> -> vector<128x128xf32>
    %16 = vector.broadcast %3 : f32 to vector<128x128xf32>
    %17 = arith.mulf %15, %16 : vector<128x128xf32>
    %18 = arith.addf %13, %17 : vector<128x128xf32>
    %19 = arith.truncf %15 : vector<128x128xf32> to vector<128x128xbf16>
    %cst_9 = arith.constant dense<0.000000e+00> : vector<128x128xf32>
    %20 = tpu.matmul %0, %19, %cst_9 {dimension_numbers = #tpu.dot_dimension_numbers<[1], [0], [0], [1], [0, 0, 1, 1], [], []>} : vector<128x128xbf16>, vector<128x128xbf16>, vector<128x128xf32> -> vector<128x128xf32>
    %21 = vector.broadcast %4 : f32 to vector<128x128xf32>
    %22 = arith.mulf %20, %21 : vector<128x128xf32>
    %23 = arith.addf %18, %22 : vector<128x128xf32>
    %24 = arith.truncf %20 : vector<128x128xf32> to vector<128x128xbf16>
    %cst_10 = arith.constant dense<0.000000e+00> : vector<128x128xf32>
    %25 = tpu.matmul %0, %24, %cst_10 {dimension_numbers = #tpu.dot_dimension_numbers<[1], [0], [0], [1], [0, 0, 1, 1], [], []>} : vector<128x128xbf16>, vector<128x128xbf16>, vector<128x128xf32> -> vector<128x128xf32>
    %26 = vector.broadcast %5 : f32 to vector<128x128xf32>
    %27 = arith.mulf %25, %26 : vector<128x128xf32>
    %28 = arith.addf %23, %27 : vector<128x128xf32>
    %29 = arith.truncf %25 : vector<128x128xf32> to vector<128x128xbf16>
    %cst_11 = arith.constant dense<0.000000e+00> : vector<128x128xf32>
    %30 = tpu.matmul %0, %29, %cst_11 {dimension_numbers = #tpu.dot_dimension_numbers<[1], [0], [0], [1], [0, 0, 1, 1], [], []>} : vector<128x128xbf16>, vector<128x128xbf16>, vector<128x128xf32> -> vector<128x128xf32>
    %31 = vector.broadcast %6 : f32 to vector<128x128xf32>
    %32 = arith.mulf %30, %31 : vector<128x128xf32>
    %33 = arith.addf %28, %32 : vector<128x128xf32>
    %cst_12 = arith.constant 0.000000e+00 : f32
    %34 = vector.broadcast %cst_12 : f32 to vector<128x128xf32>
    %35 = arith.maximumf %33, %34 : vector<128x128xf32>
    %36 = arith.truncf %35 : vector<128x128xf32> to vector<128x128xbf16>
    %c5 = arith.constant 5 : index
    %37 = memref.load %arg0[%c5] : memref<10xf32, #tpu.memory_space<smem>>
    %c6 = arith.constant 6 : index
    %38 = memref.load %arg0[%c6] : memref<10xf32, #tpu.memory_space<smem>>
    %c7 = arith.constant 7 : index
    %39 = memref.load %arg0[%c7] : memref<10xf32, #tpu.memory_space<smem>>
    %c8 = arith.constant 8 : index
    %40 = memref.load %arg0[%c8] : memref<10xf32, #tpu.memory_space<smem>>
    %c9 = arith.constant 9 : index
    %41 = memref.load %arg0[%c9] : memref<10xf32, #tpu.memory_space<smem>>
    %c0_13 = arith.constant 0 : index
    %c0_14 = arith.constant 0 : index
    %42 = vector.load %arg5[%c0_13, %c0_14] : memref<128x128xbf16, #tpu.memory_space<vmem>>, vector<128x128xbf16>
    %c0_15 = arith.constant 0 : index
    %c0_16 = arith.constant 0 : index
    %43 = vector.load %arg6[%c0_15, %c0_16] : memref<1x128xf32, #tpu.memory_space<vmem>>, vector<1x128xf32>
    %cst_17 = arith.constant dense<0.000000e+00> : vector<128x128xf32>
    %44 = tpu.matmul %36, %42, %cst_17 {dimension_numbers = #tpu.dot_dimension_numbers<[1], [0], [0], [1], [0, 0, 1, 1], [], []>} : vector<128x128xbf16>, vector<128x128xbf16>, vector<128x128xf32> -> vector<128x128xf32>
    %45 = vector.broadcast %43 : vector<1x128xf32> to vector<128x128xf32>
    %46 = arith.addf %44, %45 : vector<128x128xf32>
    %47 = vector.broadcast %37 : f32 to vector<128x128xf32>
    %48 = arith.mulf %46, %47 : vector<128x128xf32>
    %49 = arith.truncf %46 : vector<128x128xf32> to vector<128x128xbf16>
    %cst_18 = arith.constant dense<0.000000e+00> : vector<128x128xf32>
    %50 = tpu.matmul %0, %49, %cst_18 {dimension_numbers = #tpu.dot_dimension_numbers<[1], [0], [0], [1], [0, 0, 1, 1], [], []>} : vector<128x128xbf16>, vector<128x128xbf16>, vector<128x128xf32> -> vector<128x128xf32>
    %51 = vector.broadcast %38 : f32 to vector<128x128xf32>
    %52 = arith.mulf %50, %51 : vector<128x128xf32>
    %53 = arith.addf %48, %52 : vector<128x128xf32>
    %54 = arith.truncf %50 : vector<128x128xf32> to vector<128x128xbf16>
    %cst_19 = arith.constant dense<0.000000e+00> : vector<128x128xf32>
    %55 = tpu.matmul %0, %54, %cst_19 {dimension_numbers = #tpu.dot_dimension_numbers<[1], [0], [0], [1], [0, 0, 1, 1], [], []>} : vector<128x128xbf16>, vector<128x128xbf16>, vector<128x128xf32> -> vector<128x128xf32>
    %56 = vector.broadcast %39 : f32 to vector<128x128xf32>
    %57 = arith.mulf %55, %56 : vector<128x128xf32>
    %58 = arith.addf %53, %57 : vector<128x128xf32>
    %59 = arith.truncf %55 : vector<128x128xf32> to vector<128x128xbf16>
    %cst_20 = arith.constant dense<0.000000e+00> : vector<128x128xf32>
    %60 = tpu.matmul %0, %59, %cst_20 {dimension_numbers = #tpu.dot_dimension_numbers<[1], [0], [0], [1], [0, 0, 1, 1], [], []>} : vector<128x128xbf16>, vector<128x128xbf16>, vector<128x128xf32> -> vector<128x128xf32>
    %61 = vector.broadcast %40 : f32 to vector<128x128xf32>
    %62 = arith.mulf %60, %61 : vector<128x128xf32>
    %63 = arith.addf %58, %62 : vector<128x128xf32>
    %64 = arith.truncf %60 : vector<128x128xf32> to vector<128x128xbf16>
    %cst_21 = arith.constant dense<0.000000e+00> : vector<128x128xf32>
    %65 = tpu.matmul %0, %64, %cst_21 {dimension_numbers = #tpu.dot_dimension_numbers<[1], [0], [0], [1], [0, 0, 1, 1], [], []>} : vector<128x128xbf16>, vector<128x128xbf16>, vector<128x128xf32> -> vector<128x128xf32>
    %66 = vector.broadcast %41 : f32 to vector<128x128xf32>
    %67 = arith.mulf %65, %66 : vector<128x128xf32>
    %68 = arith.addf %63, %67 : vector<128x128xf32>
    %cst_22 = arith.constant 0.000000e+00 : f32
    %69 = vector.broadcast %cst_22 : f32 to vector<128x128xf32>
    %70 = arith.maximumf %68, %69 : vector<128x128xf32>
    %71 = arith.truncf %70 : vector<128x128xf32> to vector<128x128xbf16>
    %c0_23 = arith.constant 0 : index
    %c0_24 = arith.constant 0 : index
    %72 = vector.load %arg7[%c0_23, %c0_24] : memref<128x128xbf16, #tpu.memory_space<vmem>>, vector<128x128xbf16>
    %cst_25 = arith.constant dense<0.000000e+00> : vector<128x128xf32>
    %73 = tpu.matmul %71, %72, %cst_25 {dimension_numbers = #tpu.dot_dimension_numbers<[1], [0], [0], [1], [0, 0, 1, 1], [], []>} : vector<128x128xbf16>, vector<128x128xbf16>, vector<128x128xf32> -> vector<128x128xf32>
    %c0_26 = arith.constant 0 : index
    %c0_27 = arith.constant 0 : index
    %74 = vector.load %arg8[%c0_26, %c0_27] : memref<1x128xf32, #tpu.memory_space<vmem>>, vector<1x128xf32>
    %75 = vector.broadcast %74 : vector<1x128xf32> to vector<128x128xf32>
    %76 = arith.addf %73, %75 : vector<128x128xf32>
    %cst_28 = arith.constant dense<0xFF800000> : vector<128xf32>
    %77 = vector.multi_reduction <maximumf>, %76, %cst_28 [1] : vector<128x128xf32> to vector<128xf32>
    %78 = vector.shape_cast %77 : vector<128xf32> to vector<128x1xf32>
    %79 = vector.broadcast %78 : vector<128x1xf32> to vector<128x128xf32>
    %80 = arith.subf %76, %79 : vector<128x128xf32>
    %81 = math.exp %80 : vector<128x128xf32>
    %cst_29 = arith.constant dense<0.000000e+00> : vector<128xf32>
    %82 = vector.multi_reduction <add>, %81, %cst_29 [1] : vector<128x128xf32> to vector<128xf32>
    %83 = vector.shape_cast %82 : vector<128xf32> to vector<128x1xf32>
    %84 = math.log %83 : vector<128x1xf32>
    %85 = vector.broadcast %84 : vector<128x1xf32> to vector<128x128xf32>
    %86 = arith.subf %80, %85 : vector<128x128xf32>
    %c0_30 = arith.constant 0 : index
    %c0_31 = arith.constant 0 : index
    %87 = vector.load %arg9[%c0_30, %c0_31] : memref<128x128xf32, #tpu.memory_space<vmem>>, vector<128x128xf32>
    tpu.vector_store %arg9[%c0_30, %c0_31], %86 {strides = array<i32>} : memref<128x128xf32, #tpu.memory_space<vmem>>, vector<128x128xf32>,
    return
  }
}

</mosaic_0001>

<bundles_post_ra>
// kernel: tpu_custom_call.1
= control target key start
LH: loop header
LB: loop body
LE: loop exit
PB: predicated region body
PF: predicated region fallthrough
CT: control target
= control target key end

     0   :  { %14 = vsyncpa [#allocation5], 0  ;;  %s3987_s0 = inlined_call_operand.hbm [shape: f32[10], index: 0, kind: input, shape index: {}]   ;;  %s3988_s1 = inlined_call_operand.hbm [shape: bf16[128,128], index: 1, kind: input, shape index: {}]   ;;  %s3989_s2 = inlined_call_operand.hbm [shape: bf16[128,128], index: 2, kind: input, shape index: {}]   ;;  %s3990_s3 = inlined_call_operand.hbm [shape: bf16[128,128], index: 3, kind: input, shape index: {}]   ;;  %s3991_s4 = inlined_call_operand.vmem [shape: f32[1,128], index: 4, kind: input, shape index: {}]   ;;  %s3992_s5 = inlined_call_operand.hbm [shape: bf16[128,128], index: 5, kind: input, shape index: {}]   ;;  %s3993_s6 = inlined_call_operand.vmem [shape: f32[1,128], index: 6, kind: input, shape index: {}]   ;;  %s3994_s7 = inlined_call_operand.hbm [shape: bf16[128,128], index: 7, kind: input, shape index: {}]   ;;  %s3995_s8 = inlined_call_operand.vmem [shape: f32[1,128], index: 8, kind: input, shape index: {}]   ;;  %s3996_s9 = inlined_call_operand.hbm [shape: f32[128,128], index: 9, kind: output, shape index: {}]  }
   0x1   :  { %15 = vsyncpa [#allocation3], 0 }
   0x2   :  { %16 = vsyncpa [#allocation8], 0 }
   0x3   :  { %17 = vsyncpa [#allocation11], 0 }
   0x4   :  { %18 = vsyncpa [#allocation4], 0  ;;  %s3008_s30 = smov [#allocation7]   ;;  %s3009_s11 = smov [#allocation10]  }
   0x5   :  { %s44_s10 = sshll.u32 %s3008_s30, 4  ;;  %s70_s12 = sshll.u32 %s3009_s11, 4  ;;  %s45_s10 = int_to_ptr.vmem [resolvable:$true] %s44_s10  ;;  %s3069_s12 = int_to_ptr.vmem [resolvable:$true] %s70_s12 }
   0x6   :  { %s2856_s15 = scalar_lea.hbm %s3989_s2, 1024 }
   0x7   :  { %p2857_p0 = scmp.ne.s32.totalorder %s3989_s2, %s2856_s15  ;;  %p2860_p1 = scmp.lt.u32.totalorder %s2856_s15, %s3989_s2 }
   0x9   :  { %p2862_p2 = pnand %p2860_p1, %p2857_p0 }
   0xb   :  { %2865 = shalt.err (!%p2862_p2)
}
   0xc   :  { %s2866_s20 = scalar_lea.vmem %s45_s10, 1024  ;;  %p2871_p4 = scmp.lt.s32.totalorder %s45_s10, %s45_s10 }
   0xd   :  { %p2867_p3 = scmp.ne.s32.totalorder %s45_s10, %s2866_s20  ;;  %p2872_p5 = scmp.lt.s32.totalorder %s2866_s20, %s2866_s20 }
   0xf   :  { %p2873_p6 = por %p2872_p5, %p2871_p4 }
  0x11   :  { %p2874_p7 = pnand %p2873_p6, %p2867_p3 }
  0x13   :  { %2877 = shalt.err (!%p2874_p7)
}
  0x14   :  { %s3010_s21 = smov 64   ;;  %s3011_s22 = smov 4  }
  0x15   :  { %50 = dma.hbm_to_vmem [thread:$0]  %s3989_s2, 1024, %s45_s10, [#allocation8], %s3010_s21, %s3010_s21, %s3011_s22  }
  0x16   :  { %s2878_s27 = scalar_lea.hbm %s3992_s5, 1024 }
  0x17   :  { %p2879_p8 = scmp.ne.s32.totalorder %s3992_s5, %s2878_s27  ;;  %p2882_p9 = scmp.lt.u32.totalorder %s2878_s27, %s3992_s5 }
  0x19   :  { %p2884_p10 = pnand %p2882_p9, %p2879_p8 }
  0x1b   :  { %2887 = shalt.err (!%p2884_p10)
}
  0x1c   :  { %s2888_s13 = scalar_lea.vmem %s3069_s12, 1024  ;;  %p2893_p12 = scmp.lt.s32.totalorder %s3069_s12, %s3069_s12 }
  0x1d   :  { %p2889_p11 = scmp.ne.s32.totalorder %s3069_s12, %s2888_s13  ;;  %p2894_p13 = scmp.lt.s32.totalorder %s2888_s13, %s2888_s13 }
  0x1f   :  { %p2895_p0 = por %p2894_p13, %p2893_p12 }
  0x21   :  { %p2896_p1 = pnand %p2895_p0, %p2889_p11 }
  0x23   :  { %2899 = shalt.err (!%p2896_p1)
}
  0x24   :  { %76 = dma.hbm_to_vmem [thread:$0]  %s3992_s5, 1024, %s3069_s12, [#allocation11], %s3010_s21, %s3010_s21, %s3011_s22  }
  0x25   :  { %s2900_s16 = scalar_lea.hbm %s3987_s0, 16 }
  0x26   :  { %p2901_p2 = scmp.ne.s32.totalorder %s3987_s0, %s2900_s16  ;;  %p2904_p3 = scmp.lt.u32.totalorder %s2900_s16, %s3987_s0 }
  0x28   :  { %p2906_p4 = pnand %p2904_p3, %p2901_p2 }
  0x2a   :  { %2909 = shalt.err (!%p2906_p4)
}
  0x2b   :  { %s3012_s23 = smov [#allocation2]   ;;  %s3013_s5 = smov [#allocation6]  }
  0x2c   :  { %26 = dma.hbm_to_smem %s3987_s0, 16, %s3012_s23, [#allocation5]  }
  0x2d   :  { %s32_s12 = sshll.u32 %s3013_s5, 4  ;;  %s3014_s26 = smov [#allocation9]   ;;  %s33_s12 = int_to_ptr.vmem [resolvable:$true] %s32_s12 }
  0x2e   :  { %s56_s27 = sshll.u32 %s3014_s26, 4  ;;  %s2910_s30 = scalar_lea.hbm %s3988_s1, 1024  ;;  %s57_s27 = int_to_ptr.vmem [resolvable:$true] %s56_s27 }
  0x2f   :  { %p2911_p5 = scmp.ne.s32.totalorder %s3988_s1, %s2910_s30  ;;  %p2914_p6 = scmp.lt.u32.totalorder %s2910_s30, %s3988_s1 }
  0x31   :  { %p2916_p7 = pnand %p2914_p6, %p2911_p5 }
  0x33   :  { %2919 = shalt.err (!%p2916_p7)
}
  0x34   :  { %s2920_s0 = scalar_lea.vmem %s33_s12, 1024  ;;  %p2925_p9 = scmp.lt.s32.totalorder %s33_s12, %s33_s12 }
  0x35   :  { %p2921_p8 = scmp.ne.s32.totalorder %s33_s12, %s2920_s0  ;;  %p2926_p10 = scmp.lt.s32.totalorder %s2920_s0, %s2920_s0 }
  0x37   :  { %p2927_p11 = por %p2926_p10, %p2925_p9 }
  0x39   :  { %p2928_p12 = pnand %p2927_p11, %p2921_p8 }
  0x3b   :  { %2931 = shalt.err (!%p2928_p12)
}
  0x3c   :  { %38 = dma.hbm_to_vmem [thread:$0]  %s3988_s1, 1024, %s33_s12, [#allocation3], %s3010_s21, %s3010_s21, %s3011_s22  }
  0x3d   :  { %s2932_s18 = scalar_lea.hbm %s3990_s3, 1024 }
  0x3e   :  { %p2933_p13 = scmp.ne.s32.totalorder %s3990_s3, %s2932_s18  ;;  %p2936_p0 = scmp.lt.u32.totalorder %s2932_s18, %s3990_s3 }
  0x40   :  { %p2938_p1 = pnand %p2936_p0, %p2933_p13 }
  0x42   :  { %2941 = shalt.err (!%p2938_p1)
}
  0x43   :  { %s2942_s25 = scalar_lea.vmem %s57_s27, 1024  ;;  %p2947_p3 = scmp.lt.s32.totalorder %s57_s27, %s57_s27 }
  0x44   :  { %p2943_p2 = scmp.ne.s32.totalorder %s57_s27, %s2942_s25  ;;  %p2948_p4 = scmp.lt.s32.totalorder %s2942_s25, %s2942_s25 }
  0x46   :  { %p2949_p5 = por %p2948_p4, %p2947_p3 }
  0x48   :  { %p2950_p6 = pnand %p2949_p5, %p2943_p2 }
  0x4a   :  { %2953 = shalt.err (!%p2950_p6)
}
  0x4b   :  { %62 = dma.hbm_to_vmem [thread:$0]  %s3990_s3, 1024, %s57_s27, [#allocation8], %s3010_s21, %s3010_s21, %s3011_s22  }
  0x4c   :  { %s3015_s12 = smov [#allocation12]   ;;  %s2954_s30 = scalar_lea.hbm %s3994_s7, 1024 }
  0x4d   :  { %s84_s26 = sshll.u32 %s3015_s12, 4  ;;  %p2955_p7 = scmp.ne.s32.totalorder %s3994_s7, %s2954_s30  ;;  %s85_s26 = int_to_ptr.vmem [resolvable:$true] %s84_s26 }
  0x4e   :  { %p2958_p8 = scmp.lt.u32.totalorder %s2954_s30, %s3994_s7 }
  0x50   :  { %p2960_p9 = pnand %p2958_p8, %p2955_p7 }
  0x52   :  { %2963 = shalt.err (!%p2960_p9)
}
  0x53   :  { %s2964_s0 = scalar_lea.vmem %s85_s26, 1024  ;;  %p2969_p11 = scmp.lt.s32.totalorder %s85_s26, %s85_s26 }
  0x54   :  { %p2965_p10 = scmp.ne.s32.totalorder %s85_s26, %s2964_s0  ;;  %p2970_p12 = scmp.lt.s32.totalorder %s2964_s0, %s2964_s0 }
  0x56   :  { %p2971_p13 = por %p2970_p12, %p2969_p11 }
  0x58   :  { %p2972_p0 = pnand %p2971_p13, %p2965_p10 }
  0x5a   :  { %2975 = shalt.err (!%p2972_p0)
}
  0x5b   :  { %90 = dma.hbm_to_vmem [thread:$0]  %s3994_s7, 1024, %s85_s26, [#allocation11], %s3010_s21, %s3010_s21, %s3011_s22  }
  0x5c   :  { %2998 = dma.done.wait [#allocation5], 16  }
  0x5d   :  { %2999 = vsyncadd [#allocation5], 4294967280 }
  0x5e   :  { %3000 = dma.done.wait [#allocation3], 1024  }
  0x5f   :  { %3001 = vsyncadd [#allocation3], 4294966272 }
  0x60   :  { %3002 = dma.done.wait [#allocation8], 2048  }
  0x61   :  { %3003 = vsyncadd [#allocation8], 4294965248 }
  0x62   :  { %3004 = dma.done.wait [#allocation11], 2048  }
  0x63   :  { %3005 = vsyncadd [#allocation11], 4294965248 }
  0x64   :  { %111 = sfence }
  0x65   :  { %v2744_v0 = vld [vmem:[#allocation9] sm:$0xff]   ;;  %v2745_v1 = vld [vmem:[#allocation9 + $0x8] sm:$0xff]   ;;  %v2746_v2 = vld [vmem:[#allocation9 + $0x10] sm:$0xff]   ;;  %s2137_s22 = sld [smem:[#allocation2 + $0x1]]  ;;  %s2138_s14 = sld [smem:[#allocation2 + $0x2]] }
  0x66   :  { %2365 = vmatprep.subr.bf16.mxu0 %v2744_v0  ;;  %v2747_v3 = vld [vmem:[#allocation9 + $0x18] sm:$0xff]   ;;  %v2752_v4 = vld [vmem:[#allocation6] sm:$0xff]   ;;  %v2749_v6 = vld [vmem:[#allocation9 + $0x28] sm:$0xff]   ;;  %s2139_s15 = sld [smem:[#allocation2 + $0x3]]  ;;  %s2140_s16 = sld [smem:[#allocation2 + $0x4]] }
  0x67   :  { %2366 = vmatpush3.bf16.msra.mxu0 %v2744_v0  ;;  %2381 = vmatprep.mubr.bf16.mxu0 %v2752_v4  ;;  %v2748_v5 = vld [vmem:[#allocation9 + $0x20] sm:$0xff]   ;;  %v2750_v7 = vld [vmem:[#allocation9 + $0x30] sm:$0xff]   ;;  %v2751_v8 = vld [vmem:[#allocation9 + $0x38] sm:$0xff]   ;;  %s2167_s19 = sld [smem:[#allocation2 + $0x6]]  ;;  %s2168_s20 = sld [smem:[#allocation2 + $0x7]] }
  0x68   :  { %2367 = vmatprep.subr.bf16.mxu0 %v2745_v1  ;;  %v2753_v9 = vld [vmem:[#allocation6 + $0x8] sm:$0xff]   ;;  %v2754_v10 = vld [vmem:[#allocation6 + $0x10] sm:$0xff]   ;;  %v2755_v11 = vld [vmem:[#allocation6 + $0x18] sm:$0xff]   ;;  %s2169_s23 = sld [smem:[#allocation2 + $0x8]]  ;;  %s2170_s24 = sld [smem:[#allocation2 + $0x9]] }
  0x69   :  { %v2756_v12 = vld [vmem:[#allocation6 + $0x20] sm:$0xff]   ;;  %v2757_v13 = vld [vmem:[#allocation6 + $0x28] sm:$0xff]   ;;  %v2758_v14 = vld [vmem:[#allocation6 + $0x30] sm:$0xff]  }
  0x6a   :  { %v2759_v15 = vld [vmem:[#allocation6 + $0x38] sm:$0xff]   ;;  %v3163_v16 = vld [vmem:[#allocation7] sm:$0xff]   ;;  %v3218_v58 = vld [vmem:[#allocation7 + $0x8] sm:$0xff]  }
  0x6b   :  { %2368 = vmatpush3.bf16.msra.mxu0 %v2745_v1  ;;  %2413 = vmatprep.mubr.bf16.mxu1 %v3163_v16  ;;  %v2141_v18 = vld [vmem:[%s3991_s4] ss:$0 sm:$0xff]  ;;  %v3220_v59 = vld [vmem:[#allocation7 + $0x10] sm:$0xff]   ;;  %v3224_v60 = vld [vmem:[#allocation7 + $0x18] sm:$0xff]   ;;  %s145_s4 = sld [smem:[#allocation2]] }
  0x6c   :  { %2369 = vmatprep.subr.bf16.mxu0 %v2746_v2  ;;  %v3226_v61 = vld [vmem:[#allocation7 + $0x20] sm:$0xff]   ;;  %v3230_v62 = vld [vmem:[#allocation7 + $0x28] sm:$0xff]   ;;  %v3232_v63 = vld [vmem:[#allocation7 + $0x30] sm:$0xff]  }
  0x6d   :  { %v3236_v0 = vld [vmem:[#allocation7 + $0x38] sm:$0xff]  }
  0x6f   :  { %2370 = vmatpush3.bf16.msra.mxu0 %v2746_v2  ;;  %v3242_v2 = vstv %s2137_s22 }
  0x70   :  { %2371 = vmatprep.subr.bf16.mxu0 %v2747_v3 }
  0x71   :  { %v3240_v1 = vstv %s145_s4 }
  0x73   :  { %2372 = vmatpush3.bf16.msra.mxu0 %v2747_v3 }
  0x74   :  { %2373 = vmatprep.subr.bf16.mxu0 %v2748_v5 }
  0x77   :  { %2374 = vmatpush3.bf16.msra.mxu0 %v2748_v5 }
  0x78   :  { %2375 = vmatprep.subr.bf16.mxu0 %v2749_v6 }
  0x7b   :  { %2376 = vmatpush3.bf16.msra.mxu0 %v2749_v6 }
  0x7c   :  { %2377 = vmatprep.subr.bf16.mxu0 %v2750_v7 }
  0x7f   :  { %2378 = vmatpush3.bf16.msra.mxu0 %v2750_v7 }
  0x80   :  { %2379 = vmatprep.subr.bf16.mxu0 %v2751_v8 }
  0x83   :  { %2380 = vmatpush3.bf16.msra.mxu0 %v2751_v8 }
  0x86   :  { %2382 = vmatmul.mubr.bf16.vlgmr.msra.gmra.mrb[0].mxu0 %v2753_v9 }
  0x87   :  { %2385 = vmatprep.mubr.bf16.mxu0 %v2754_v10 }
  0x8e   :  { %2386 = vmatmul.mubr.bf16.gmra.mrb[4].mxu0 %v2755_v11 }
  0x8f   :  { %2389 = vmatprep.mubr.bf16.mxu0 %v2756_v12 }
  0x96   :  { %2390 = vmatmul.mubr.bf16.gmra.mrb[8].mxu0 %v2757_v13 }
  0x97   :  { %2393 = vmatprep.mubr.bf16.mxu0 %v2758_v14 }
  0x9e   :  { %2394 = vmatmul.mubr.bf16.gmra.mrb[12].mxu0 %v2759_v15 }
  0x9f   :  { %2445 = vmatprep.mubr.bf16.mxu0 %v3163_v16 }
 0x159   :  { %v2383_v17 = vpop.f32.mrb[0].mxu0 }
 0x15a   :  { %v303_v19 = vpop.f32.mrb[1].mxu0  ;;  %v3170_v21 = vadd.f32 %v2383_v17, %v2141_v18 }
 0x15b   :  { %v2384_v20 = vpop.f32.mrb[2].mxu0  ;;  %v3174_v24 = vadd.f32 %v2141_v18, %v303_v19 }
 0x15c   :  { %v3172_v22 = vadd.f32 %v2384_v20, %v2141_v18  ;;  %v306_v23 = vpop.f32.mrb[3].mxu0  ;;  %v369_v4 = vmul.f32 %v3240_v1, %v3170_v21 }
 0x15d   :  { %v3176_v25 = vadd.f32 %v2141_v18, %v306_v23  ;;  %v367_v7 = vmul.f32 %v3240_v1, %v3174_v24 }
 0x15e   :  { %v384_v26 = vpack.c.bf16 %v3172_v22, %v3170_v21  ;;  %v370_v10 = vmul.f32 %v3240_v1, %v3172_v22 }
 0x15f   :  { %v383_v27 = vpack.c.bf16 %v3176_v25, %v3174_v24  ;;  %v368_v15 = vmul.f32 %v3240_v1, %v3176_v25 }
 0x161   :  { %v2387_v28 = vpop.f32.mrb[4].mxu0  ;;  %2397 = vmatprep.subr.bf16.mxu1 %v383_v27 }
 0x162   :  { %v319_v29 = vpop.f32.mrb[5].mxu0  ;;  %2398 = vmatpush3.bf16.msra.mxu1 %v383_v27  ;;  %v3182_v31 = vadd.f32 %v2387_v28, %v2141_v18 }
 0x163   :  { %v2388_v30 = vpop.f32.mrb[6].mxu0  ;;  %2399 = vmatprep.subr.bf16.mxu1 %v384_v26  ;;  %v3186_v34 = vadd.f32 %v2141_v18, %v319_v29 }
 0x164   :  { %v3184_v32 = vadd.f32 %v2388_v30, %v2141_v18  ;;  %v322_v33 = vpop.f32.mrb[7].mxu0  ;;  %v373_v23 = vmul.f32 %v3240_v1, %v3182_v31 }
 0x165   :  { %v3188_v35 = vadd.f32 %v2141_v18, %v322_v33  ;;  %v371_v25 = vmul.f32 %v3240_v1, %v3186_v34 }
 0x166   :  { %v386_v36 = vpack.c.bf16 %v3184_v32, %v3182_v31  ;;  %2400 = vmatpush3.bf16.msra.mxu1 %v384_v26  ;;  %v374_v29 = vmul.f32 %v3240_v1, %v3184_v32 }
 0x167   :  { %v385_v37 = vpack.c.bf16 %v3188_v35, %v3186_v34  ;;  %v372_v31 = vmul.f32 %v3240_v1, %v3188_v35 }
 0x169   :  { %v2391_v38 = vpop.f32.mrb[8].mxu0  ;;  %2401 = vmatprep.subr.bf16.mxu1 %v385_v37 }
 0x16a   :  { %v335_v39 = vpop.f32.mrb[9].mxu0  ;;  %2402 = vmatpush3.bf16.msra.mxu1 %v385_v37  ;;  %v3194_v41 = vadd.f32 %v2391_v38, %v2141_v18 }
 0x16b   :  { %v2392_v40 = vpop.f32.mrb[10].mxu0  ;;  %2403 = vmatprep.subr.bf16.mxu1 %v386_v36  ;;  %v3198_v44 = vadd.f32 %v2141_v18, %v335_v39 }
 0x16c   :  { %v3196_v42 = vadd.f32 %v2392_v40, %v2141_v18  ;;  %v338_v43 = vpop.f32.mrb[11].mxu0 }
 0x16d   :  { %v3200_v45 = vadd.f32 %v2141_v18, %v338_v43  ;;  %v375_v35 = vmul.f32 %v3240_v1, %v3198_v44 }
 0x16e   :  { %v388_v46 = vpack.c.bf16 %v3196_v42, %v3194_v41  ;;  %2404 = vmatpush3.bf16.msra.mxu1 %v386_v36 }
 0x16f   :  { %v387_v47 = vpack.c.bf16 %v3200_v45, %v3198_v44 }
 0x171   :  { %v2395_v48 = vpop.f32.mrb[12].mxu0  ;;  %2405 = vmatprep.subr.bf16.mxu1 %v387_v47 }
 0x172   :  { %v351_v49 = vpop.f32.mrb[13].mxu0  ;;  %2406 = vmatpush3.bf16.msra.mxu1 %v387_v47  ;;  %v3206_v51 = vadd.f32 %v2395_v48, %v2141_v18 }
 0x173   :  { %v2396_v50 = vpop.f32.mrb[14].mxu0  ;;  %2407 = vmatprep.subr.bf16.mxu1 %v388_v46  ;;  %v3210_v54 = vadd.f32 %v2141_v18, %v351_v49 }
 0x174   :  { %v3208_v52 = vadd.f32 %v2396_v50, %v2141_v18  ;;  %v354_v53 = vpop.f32.mrb[15].mxu0 }
 0x175   :  { %v3212_v55 = vadd.f32 %v2141_v18, %v354_v53  ;;  %v378_v53 = vmul.f32 %v3240_v1, %v3196_v42 }
 0x176   :  { %v390_v56 = vpack.c.bf16 %v3208_v52, %v3206_v51  ;;  %2408 = vmatpush3.bf16.msra.mxu1 %v388_v46  ;;  %v377_v46 = vmul.f32 %v3240_v1, %v3194_v41  ;;  %v376_v41 = vmul.f32 %v3240_v1, %v3200_v45  ;;  %v379_v45 = vmul.f32 %v3240_v1, %v3210_v54 }
 0x177   :  { %v389_v57 = vpack.c.bf16 %v3212_v55, %v3210_v54 }
 0x179   :  { %2409 = vmatprep.subr.bf16.mxu1 %v389_v57 }
 0x17a   :  { %2410 = vmatpush3.bf16.msra.mxu1 %v389_v57 }
 0x17b   :  { %2411 = vmatprep.subr.bf16.mxu1 %v390_v56 }
 0x17e   :  { %2412 = vmatpush3.bf16.msra.mxu1 %v390_v56 }
 0x181   :  { %2414 = vmatmul.mubr.bf16.vlgmr.msra.gmra.mrb[0].mxu1 %v3218_v58 }
 0x182   :  { %2417 = vmatprep.mubr.bf16.mxu1 %v3220_v59 }
 0x189   :  { %2418 = vmatmul.mubr.bf16.gmra.mrb[4].mxu1 %v3224_v60 }
 0x18a   :  { %2421 = vmatprep.mubr.bf16.mxu1 %v3226_v61 }
 0x191   :  { %2422 = vmatmul.mubr.bf16.gmra.mrb[8].mxu1 %v3230_v62 }
 0x192   :  { %2425 = vmatprep.mubr.bf16.mxu1 %v3232_v63 }
 0x199   :  { %2426 = vmatmul.mubr.bf16.gmra.mrb[12].mxu1 %v3236_v0 }
 0x19a   :  { %2477 = vmatprep.mubr.bf16.mxu1 %v3163_v16 }
 0x254   :  { %v2415_v3 = vpop.f32.mrb[0].mxu1 }
 0x255   :  { %v539_v5 = vmul.f32 %v2415_v3, %v3242_v2  ;;  %v473_v6 = vpop.f32.mrb[1].mxu1 }
 0x256   :  { %v537_v8 = vmul.f32 %v3242_v2, %v473_v6  ;;  %v2416_v9 = vpop.f32.mrb[2].mxu1 }
 0x257   :  { %v3252_v11 = vadd.f32 %v539_v5, %v369_v4  ;;  %v540_v12 = vmul.f32 %v2416_v9, %v3242_v2  ;;  %v570_v13 = vpack.c.bf16 %v2416_v9, %v2415_v3  ;;  %v476_v14 = vpop.f32.mrb[3].mxu1  ;;  %v381_v9 = vmul.f32 %v3240_v1, %v3206_v51 }
 0x258   :  { %v3257_v17 = vadd.f32 %v537_v8, %v367_v7  ;;  %v538_v18 = vmul.f32 %v3242_v2, %v476_v14  ;;  %v569_v19 = vpack.c.bf16 %v476_v14, %v473_v6  ;;  %v380_v51 = vmul.f32 %v3240_v1, %v3212_v55 }
 0x259   :  { %v3260_v20 = vadd.f32 %v540_v12, %v370_v10 }
 0x25a   :  { %v3262_v21 = vadd.f32 %v538_v18, %v368_v15  ;;  %2429 = vmatprep.subr.bf16.mxu0 %v569_v19  ;;  %v382_v15 = vmul.f32 %v3240_v1, %v3208_v52  ;;  %v3332_v52 = vstv %s2138_s14 }
 0x25b   :  { %2430 = vmatpush3.bf16.msra.mxu0 %v569_v19 }
 0x25c   :  { %v2419_v22 = vpop.f32.mrb[4].mxu1  ;;  %2431 = vmatprep.subr.bf16.mxu0 %v570_v13 }
 0x25d   :  { %v543_v24 = vmul.f32 %v2419_v22, %v3242_v2  ;;  %v489_v26 = vpop.f32.mrb[5].mxu1 }
 0x25e   :  { %v541_v27 = vmul.f32 %v3242_v2, %v489_v26  ;;  %v2420_v28 = vpop.f32.mrb[6].mxu1 }
 0x25f   :  { %v3272_v30 = vadd.f32 %v543_v24, %v373_v23  ;;  %v544_v33 = vmul.f32 %v2420_v28, %v3242_v2  ;;  %v572_v36 = vpack.c.bf16 %v2420_v28, %v2419_v22  ;;  %v492_v37 = vpop.f32.mrb[7].mxu1  ;;  %2432 = vmatpush3.bf16.msra.mxu0 %v570_v13 }
 0x260   :  { %v3277_v38 = vadd.f32 %v541_v27, %v371_v25  ;;  %v542_v34 = vmul.f32 %v3242_v2, %v492_v37  ;;  %v571_v39 = vpack.c.bf16 %v492_v37, %v489_v26 }
 0x261   :  { %v3280_v40 = vadd.f32 %v544_v33, %v374_v29 }
 0x262   :  { %v3282_v43 = vadd.f32 %v542_v34, %v372_v31  ;;  %2433 = vmatprep.subr.bf16.mxu0 %v571_v39 }
 0x263   :  { %2434 = vmatpush3.bf16.msra.mxu0 %v571_v39 }
 0x264   :  { %v2423_v32 = vpop.f32.mrb[8].mxu1  ;;  %2435 = vmatprep.subr.bf16.mxu0 %v572_v36 }
 0x265   :  { %v547_v47 = vmul.f32 %v2423_v32, %v3242_v2  ;;  %v505_v48 = vpop.f32.mrb[9].mxu1 }
 0x266   :  { %v545_v49 = vmul.f32 %v3242_v2, %v505_v48  ;;  %v2424_v50 = vpop.f32.mrb[10].mxu1 }
 0x267   :  { %v3292_v56 = vadd.f32 %v547_v47, %v377_v46  ;;  %v548_v57 = vmul.f32 %v2424_v50, %v3242_v2  ;;  %v574_v3 = vpack.c.bf16 %v2424_v50, %v2423_v32  ;;  %v508_v4 = vpop.f32.mrb[11].mxu1  ;;  %2436 = vmatpush3.bf16.msra.mxu0 %v572_v36 }
 0x268   :  { %v3297_v5 = vadd.f32 %v545_v49, %v375_v35  ;;  %v546_v44 = vmul.f32 %v3242_v2, %v508_v4  ;;  %v573_v6 = vpack.c.bf16 %v508_v4, %v505_v48 }
 0x269   :  { %v3300_v7 = vadd.f32 %v548_v57, %v378_v53 }
 0x26a   :  { %v3302_v8 = vadd.f32 %v546_v44, %v376_v41  ;;  %2437 = vmatprep.subr.bf16.mxu0 %v573_v6 }
 0x26b   :  { %2438 = vmatpush3.bf16.msra.mxu0 %v573_v6 }
 0x26c   :  { %v2427_v42 = vpop.f32.mrb[12].mxu1  ;;  %2439 = vmatprep.subr.bf16.mxu0 %v574_v3 }
 0x26d   :  { %v551_v10 = vmul.f32 %v2427_v42, %v3242_v2  ;;  %v521_v12 = vpop.f32.mrb[13].mxu1 }
 0x26e   :  { %v549_v13 = vmul.f32 %v3242_v2, %v521_v12  ;;  %v2428_v14 = vpop.f32.mrb[14].mxu1 }
 0x26f   :  { %v3312_v18 = vadd.f32 %v551_v10, %v381_v9  ;;  %v552_v19 = vmul.f32 %v2428_v14, %v3242_v2  ;;  %v576_v22 = vpack.c.bf16 %v2428_v14, %v2427_v42  ;;  %v524_v23 = vpop.f32.mrb[15].mxu1  ;;  %2440 = vmatpush3.bf16.msra.mxu0 %v574_v3 }
 0x270   :  { %v3317_v24 = vadd.f32 %v549_v13, %v379_v45  ;;  %v550_v54 = vmul.f32 %v3242_v2, %v524_v23  ;;  %v575_v26 = vpack.c.bf16 %v524_v23, %v521_v12 }
 0x271   :  { %v3320_v25 = vadd.f32 %v552_v19, %v382_v15 }
 0x272   :  { %v3322_v27 = vadd.f32 %v550_v54, %v380_v51  ;;  %2441 = vmatprep.subr.bf16.mxu0 %v575_v26 }
 0x273   :  { %2442 = vmatpush3.bf16.msra.mxu0 %v575_v26 }
 0x274   :  { %2443 = vmatprep.subr.bf16.mxu0 %v576_v22 }
 0x277   :  { %2444 = vmatpush3.bf16.msra.mxu0 %v576_v22 }
 0x27a   :  { %2446 = vmatmul.mubr.bf16.vlgmr.msra.gmra.mrb[16].mxu0 %v3218_v58 }
 0x27b   :  { %2449 = vmatprep.mubr.bf16.mxu0 %v3220_v59 }
 0x282   :  { %2450 = vmatmul.mubr.bf16.gmra.mrb[20].mxu0 %v3224_v60 }
 0x283   :  { %2453 = vmatprep.mubr.bf16.mxu0 %v3226_v61 }
 0x28a   :  { %2454 = vmatmul.mubr.bf16.gmra.mrb[24].mxu0 %v3230_v62 }
 0x28b   :  { %2457 = vmatprep.mubr.bf16.mxu0 %v3232_v63 }
 0x292   :  { %2458 = vmatmul.mubr.bf16.gmra.mrb[28].mxu0 %v3236_v0 }
 0x293   :  { %2509 = vmatprep.mubr.bf16.mxu0 %v3163_v16 }
 0x34d   :  { %v2447_v55 = vpop.f32.mrb[16].mxu0 }
 0x34e   :  { %v677_v1 = vmul.f32 %v2447_v55, %v3332_v52  ;;  %v611_v2 = vpop.f32.mrb[17].mxu0 }
 0x34f   :  { %v675_v28 = vmul.f32 %v3332_v52, %v611_v2  ;;  %v2448_v29 = vpop.f32.mrb[18].mxu0 }
 0x350   :  { %v3337_v33 = vadd.f32 %v677_v1, %v3252_v11  ;;  %v678_v36 = vmul.f32 %v2448_v29, %v3332_v52  ;;  %v708_v37 = vpack.c.bf16 %v2448_v29, %v2447_v55  ;;  %v614_v31 = vpop.f32.mrb[19].mxu0 }
 0x351   :  { %v3341_v34 = vadd.f32 %v675_v28, %v3257_v17  ;;  %v676_v39 = vmul.f32 %v3332_v52, %v614_v31  ;;  %v707_v32 = vpack.c.bf16 %v614_v31, %v611_v2 }
 0x352   :  { %v3345_v46 = vadd.f32 %v678_v36, %v3260_v20  ;;  %v3405_v36 = vstv %s2139_s15 }
 0x353   :  { %v3348_v47 = vadd.f32 %v676_v39, %v3262_v21  ;;  %2461 = vmatprep.subr.bf16.mxu1 %v707_v32 }
 0x354   :  { %2462 = vmatpush3.bf16.msra.mxu1 %v707_v32 }
 0x355   :  { %v2451_v11 = vpop.f32.mrb[20].mxu0  ;;  %2463 = vmatprep.subr.bf16.mxu1 %v708_v37 }
 0x356   :  { %v681_v48 = vmul.f32 %v2451_v11, %v3332_v52  ;;  %v627_v35 = vpop.f32.mrb[21].mxu0 }
 0x357   :  { %v679_v49 = vmul.f32 %v3332_v52, %v627_v35  ;;  %v2452_v17 = vpop.f32.mrb[22].mxu0 }
 0x358   :  { %v3353_v50 = vadd.f32 %v681_v48, %v3272_v30  ;;  %v682_v53 = vmul.f32 %v2452_v17, %v3332_v52  ;;  %v710_v20 = vpack.c.bf16 %v2452_v17, %v2451_v11  ;;  %v630_v57 = vpop.f32.mrb[23].mxu0  ;;  %2464 = vmatpush3.bf16.msra.mxu1 %v708_v37 }
 0x359   :  { %v3357_v21 = vadd.f32 %v679_v49, %v3277_v38  ;;  %v680_v3 = vmul.f32 %v3332_v52, %v630_v57  ;;  %v709_v4 = vpack.c.bf16 %v630_v57, %v627_v35 }
 0x35a   :  { %v3361_v41 = vadd.f32 %v682_v53, %v3280_v40 }
 0x35b   :  { %v3364_v44 = vadd.f32 %v680_v3, %v3282_v43  ;;  %2465 = vmatprep.subr.bf16.mxu1 %v709_v4 }
 0x35c   :  { %2466 = vmatpush3.bf16.msra.mxu1 %v709_v4 }
 0x35d   :  { %v2455_v30 = vpop.f32.mrb[24].mxu0  ;;  %2467 = vmatprep.subr.bf16.mxu1 %v710_v20 }
 0x35e   :  { %v685_v6 = vmul.f32 %v2455_v30, %v3332_v52  ;;  %v643_v42 = vpop.f32.mrb[25].mxu0 }
 0x35f   :  { %v683_v9 = vmul.f32 %v3332_v52, %v643_v42  ;;  %v2456_v38 = vpop.f32.mrb[26].mxu0 }
 0x360   :  { %v3369_v10 = vadd.f32 %v685_v6, %v3292_v56  ;;  %v686_v12 = vmul.f32 %v2456_v38, %v3332_v52  ;;  %v712_v40 = vpack.c.bf16 %v2456_v38, %v2455_v30  ;;  %v646_v45 = vpop.f32.mrb[27].mxu0  ;;  %2468 = vmatpush3.bf16.msra.mxu1 %v710_v20 }
 0x361   :  { %v3373_v43 = vadd.f32 %v683_v9, %v3297_v5  ;;  %v684_v13 = vmul.f32 %v3332_v52, %v646_v45  ;;  %v711_v14 = vpack.c.bf16 %v646_v45, %v643_v42 }
 0x362   :  { %v3377_v15 = vadd.f32 %v686_v12, %v3300_v7 }
 0x363   :  { %v3380_v19 = vadd.f32 %v684_v13, %v3302_v8  ;;  %2469 = vmatprep.subr.bf16.mxu1 %v711_v14 }
 0x364   :  { %2470 = vmatpush3.bf16.msra.mxu1 %v711_v14 }
 0x365   :  { %v2459_v56 = vpop.f32.mrb[28].mxu0  ;;  %2471 = vmatprep.subr.bf16.mxu1 %v712_v40 }
 0x366   :  { %v689_v22 = vmul.f32 %v2459_v56, %v3332_v52  ;;  %v659_v23 = vpop.f32.mrb[29].mxu0 }
 0x367   :  { %v687_v51 = vmul.f32 %v3332_v52, %v659_v23  ;;  %v2460_v5 = vpop.f32.mrb[30].mxu0 }
 0x368   :  { %v3385_v54 = vadd.f32 %v689_v22, %v3312_v18  ;;  %v690_v26 = vmul.f32 %v2460_v5, %v3332_v52  ;;  %v714_v7 = vpack.c.bf16 %v2460_v5, %v2459_v56  ;;  %v662_v55 = vpop.f32.mrb[31].mxu0  ;;  %2472 = vmatpush3.bf16.msra.mxu1 %v712_v40  ;;  %v2768_v18 = vld [vmem:[#allocation10] sm:$0xff]  }
 0x369   :  { %v3389_v8 = vadd.f32 %v687_v51, %v3317_v24  ;;  %v688_v1 = vmul.f32 %v3332_v52, %v662_v55  ;;  %v713_v2 = vpack.c.bf16 %v662_v55, %v659_v23  ;;  %v2769_v24 = vld [vmem:[#allocation10 + $0x8] sm:$0xff]   ;;  %v2772_v52 = vld [vmem:[#allocation10 + $0x20] sm:$0xff]  }
 0x36a   :  { %v3393_v28 = vadd.f32 %v690_v26, %v3320_v25  ;;  %v2770_v25 = vld [vmem:[#allocation10 + $0x10] sm:$0xff]  }
 0x36b   :  { %v3396_v29 = vadd.f32 %v688_v1, %v3322_v27  ;;  %2473 = vmatprep.subr.bf16.mxu1 %v713_v2  ;;  %v2771_v27 = vld [vmem:[#allocation10 + $0x18] sm:$0xff]  }
 0x36c   :  { %2474 = vmatpush3.bf16.msra.mxu1 %v713_v2 }
 0x36d   :  { %2475 = vmatprep.subr.bf16.mxu1 %v714_v7 }
 0x370   :  { %2476 = vmatpush3.bf16.msra.mxu1 %v714_v7 }
 0x371   :  { %2525 = vmatprep.subr.bf16.mxu1 %v2768_v18 }
 0x373   :  { %2478 = vmatmul.mubr.bf16.vlgmr.msra.gmra.mrb[16].mxu1 %v3218_v58 }
 0x374   :  { %2481 = vmatprep.mubr.bf16.mxu1 %v3220_v59  ;;  %2526 = vmatpush3.bf16.msra.mxu1 %v2768_v18 }
 0x375   :  { %2527 = vmatprep.subr.bf16.mxu1 %v2769_v24 }
 0x378   :  { %2528 = vmatpush3.bf16.msra.mxu1 %v2769_v24 }
 0x379   :  { %2529 = vmatprep.subr.bf16.mxu1 %v2770_v25 }
 0x37b   :  { %2482 = vmatmul.mubr.bf16.gmra.mrb[20].mxu1 %v3224_v60 }
 0x37c   :  { %2485 = vmatprep.mubr.bf16.mxu1 %v3226_v61  ;;  %2530 = vmatpush3.bf16.msra.mxu1 %v2770_v25 }
 0x37d   :  { %2531 = vmatprep.subr.bf16.mxu1 %v2771_v27 }
 0x380   :  { %2532 = vmatpush3.bf16.msra.mxu1 %v2771_v27 }
 0x381   :  { %2533 = vmatprep.subr.bf16.mxu1 %v2772_v52 }
 0x383   :  { %2486 = vmatmul.mubr.bf16.gmra.mrb[24].mxu1 %v3230_v62 }
 0x384   :  { %2489 = vmatprep.mubr.bf16.mxu1 %v3232_v63  ;;  %2534 = vmatpush3.bf16.msra.mxu1 %v2772_v52 }
 0x38b   :  { %2490 = vmatmul.mubr.bf16.gmra.mrb[28].mxu1 %v3236_v0 }
 0x446   :  { %v2479_v37 = vpop.f32.mrb[16].mxu1 }
 0x447   :  { %v815_v31 = vmul.f32 %v2479_v37, %v3405_v36  ;;  %v749_v39 = vpop.f32.mrb[17].mxu1 }
 0x448   :  { %v813_v32 = vmul.f32 %v3405_v36, %v749_v39  ;;  %v2480_v11 = vpop.f32.mrb[18].mxu1 }
 0x449   :  { %v3410_v48 = vadd.f32 %v815_v31, %v3337_v33  ;;  %v816_v35 = vmul.f32 %v2480_v11, %v3405_v36  ;;  %v846_v49 = vpack.c.bf16 %v2480_v11, %v2479_v37  ;;  %v752_v17 = vpop.f32.mrb[19].mxu1 }
 0x44a   :  { %v3414_v53 = vadd.f32 %v813_v32, %v3341_v34  ;;  %v814_v20 = vmul.f32 %v3405_v36, %v752_v17  ;;  %v845_v57 = vpack.c.bf16 %v752_v17, %v749_v39 }
 0x44b   :  { %v3418_v3 = vadd.f32 %v816_v35, %v3345_v46 }
 0x44c   :  { %v3421_v4 = vadd.f32 %v814_v20, %v3348_v47  ;;  %2493 = vmatprep.subr.bf16.mxu0 %v845_v57 }
 0x44d   :  { %2494 = vmatpush3.bf16.msra.mxu0 %v845_v57 }
 0x44e   :  { %v2483_v33 = vpop.f32.mrb[20].mxu1  ;;  %2495 = vmatprep.subr.bf16.mxu0 %v846_v49 }
 0x44f   :  { %v819_v30 = vmul.f32 %v2483_v33, %v3405_v36  ;;  %v765_v6 = vpop.f32.mrb[21].mxu1 }
 0x450   :  { %v817_v42 = vmul.f32 %v3405_v36, %v765_v6  ;;  %v2484_v34 = vpop.f32.mrb[22].mxu1 }
 0x451   :  { %v3426_v9 = vadd.f32 %v819_v30, %v3353_v50  ;;  %v820_v38 = vmul.f32 %v2484_v34, %v3405_v36  ;;  %v848_v46 = vpack.c.bf16 %v2484_v34, %v2483_v33  ;;  %v768_v12 = vpop.f32.mrb[23].mxu1  ;;  %2496 = vmatpush3.bf16.msra.mxu0 %v846_v49 }
 0x452   :  { %v3430_v47 = vadd.f32 %v817_v42, %v3357_v21  ;;  %v818_v40 = vmul.f32 %v3405_v36, %v768_v12  ;;  %v847_v45 = vpack.c.bf16 %v768_v12, %v765_v6 }
 0x453   :  { %v3434_v13 = vadd.f32 %v820_v38, %v3361_v41 }
 0x454   :  { %v3437_v14 = vadd.f32 %v818_v40, %v3364_v44  ;;  %2497 = vmatprep.subr.bf16.mxu0 %v847_v45 }
 0x455   :  { %2498 = vmatpush3.bf16.msra.mxu0 %v847_v45 }
 0x456   :  { %v2487_v50 = vpop.f32.mrb[24].mxu1  ;;  %2499 = vmatprep.subr.bf16.mxu0 %v848_v46 }
 0x457   :  { %v823_v56 = vmul.f32 %v2487_v50, %v3405_v36  ;;  %v781_v22 = vpop.f32.mrb[25].mxu1 }
 0x458   :  { %v821_v23 = vmul.f32 %v3405_v36, %v781_v22  ;;  %v2488_v21 = vpop.f32.mrb[26].mxu1 }
 0x459   :  { %v3442_v51 = vadd.f32 %v823_v56, %v3369_v10  ;;  %v824_v5 = vmul.f32 %v2488_v21, %v3405_v36  ;;  %v850_v41 = vpack.c.bf16 %v2488_v21, %v2487_v50  ;;  %v784_v26 = vpop.f32.mrb[27].mxu1  ;;  %2500 = vmatpush3.bf16.msra.mxu0 %v848_v46 }
 0x45a   :  { %v3446_v44 = vadd.f32 %v821_v23, %v3373_v43  ;;  %v822_v7 = vmul.f32 %v3405_v36, %v784_v26  ;;  %v849_v55 = vpack.c.bf16 %v784_v26, %v781_v22 }
 0x45b   :  { %v3450_v1 = vadd.f32 %v824_v5, %v3377_v15 }
 0x45c   :  { %v3453_v2 = vadd.f32 %v822_v7, %v3380_v19  ;;  %2501 = vmatprep.subr.bf16.mxu0 %v849_v55 }
 0x45d   :  { %2502 = vmatpush3.bf16.msra.mxu0 %v849_v55 }
 0x45e   :  { %v2491_v10 = vpop.f32.mrb[28].mxu1  ;;  %2503 = vmatprep.subr.bf16.mxu0 %v850_v41 }
 0x45f   :  { %v827_v18 = vmul.f32 %v2491_v10, %v3405_v36  ;;  %v797_v24 = vpop.f32.mrb[29].mxu1 }
 0x460   :  { %v825_v25 = vmul.f32 %v3405_v36, %v797_v24  ;;  %v2492_v43 = vpop.f32.mrb[30].mxu1 }
 0x461   :  { %v3458_v27 = vadd.f32 %v827_v18, %v3385_v54  ;;  %v828_v52 = vmul.f32 %v2492_v43, %v3405_v36  ;;  %v852_v15 = vpack.c.bf16 %v2492_v43, %v2491_v10  ;;  %v800_v37 = vpop.f32.mrb[31].mxu1  ;;  %2504 = vmatpush3.bf16.msra.mxu0 %v850_v41  ;;  %v2773_v54 = vld [vmem:[#allocation10 + $0x28] sm:$0xff]  }
 0x462   :  { %v3462_v19 = vadd.f32 %v825_v25, %v3389_v8  ;;  %v826_v31 = vmul.f32 %v3405_v36, %v800_v37  ;;  %v851_v39 = vpack.c.bf16 %v800_v37, %v797_v24  ;;  %2535 = vmatprep.subr.bf16.mxu1 %v2773_v54  ;;  %v2774_v8 = vld [vmem:[#allocation10 + $0x30] sm:$0xff]  }
 0x463   :  { %v3466_v32 = vadd.f32 %v828_v52, %v3393_v28  ;;  %2536 = vmatpush3.bf16.msra.mxu1 %v2773_v54  ;;  %v2775_v28 = vld [vmem:[#allocation10 + $0x38] sm:$0xff]  }
 0x464   :  { %v3469_v11 = vadd.f32 %v826_v31, %v3396_v29  ;;  %2505 = vmatprep.subr.bf16.mxu0 %v851_v39  ;;  %2537 = vmatprep.subr.bf16.mxu1 %v2774_v8  ;;  %v3479_v29 = vstv %s2140_s16 }
 0x465   :  { %2506 = vmatpush3.bf16.msra.mxu0 %v851_v39 }
 0x466   :  { %2507 = vmatprep.subr.bf16.mxu0 %v852_v15 }
 0x467   :  { %2538 = vmatpush3.bf16.msra.mxu1 %v2774_v8 }
 0x468   :  { %2539 = vmatprep.subr.bf16.mxu1 %v2775_v28 }
 0x469   :  { %2508 = vmatpush3.bf16.msra.mxu0 %v852_v15 }
 0x46b   :  { %2540 = vmatpush3.bf16.msra.mxu1 %v2775_v28 }
 0x46c   :  { %2510 = vmatmul.mubr.bf16.vlgmr.msra.gmra.mrb[32].mxu0 %v3218_v58 }
 0x46d   :  { %2513 = vmatprep.mubr.bf16.mxu0 %v3220_v59 }
 0x474   :  { %2514 = vmatmul.mubr.bf16.gmra.mrb[36].mxu0 %v3224_v60 }
 0x475   :  { %2517 = vmatprep.mubr.bf16.mxu0 %v3226_v61 }
 0x47c   :  { %2518 = vmatmul.mubr.bf16.gmra.mrb[40].mxu0 %v3230_v62 }
 0x47d   :  { %2521 = vmatprep.mubr.bf16.mxu0 %v3232_v63 }
 0x484   :  { %2522 = vmatmul.mubr.bf16.gmra.mrb[44].mxu0 %v3236_v0 }
 0x485   :  { %2573 = vmatprep.mubr.bf16.mxu0 %v3163_v16 }
 0x53f   :  { %v2511_v36 = vpop.f32.mrb[32].mxu0 }
 0x540   :  { %v953_v35 = vmul.f32 %v2511_v36, %v3479_v29  ;;  %v887_v49 = vpop.f32.mrb[33].mxu0 }
 0x541   :  { %v951_v17 = vmul.f32 %v3479_v29, %v887_v49  ;;  %v2512_v20 = vpop.f32.mrb[34].mxu0 }
 0x542   :  { %v969_v57 = vadd.f32 %v953_v35, %v3410_v48  ;;  %v954_v33 = vmul.f32 %v2512_v20, %v3479_v29  ;;  %v890_v30 = vpop.f32.mrb[35].mxu0 }
 0x543   :  { %v967_v6 = vadd.f32 %v951_v17, %v3414_v53  ;;  %v952_v42 = vmul.f32 %v3479_v29, %v890_v30 }
 0x544   :  { %v970_v34 = vadd.f32 %v954_v33, %v3418_v3  ;;  %v985_v46 = vmax.f32 %v969_v57, 0.0 }
 0x545   :  { %v968_v38 = vadd.f32 %v952_v42, %v3421_v4  ;;  %v983_v40 = vmax.f32 %v967_v6, 0.0 }
 0x546   :  { %v986_v12 = vmax.f32 %v970_v34, 0.0 }
 0x547   :  { %v984_v45 = vmax.f32 %v968_v38, 0.0  ;;  %v2515_v50 = vpop.f32.mrb[36].mxu0 }
 0x548   :  { %v1000_v56 = vpack.c.bf16 %v986_v12, %v985_v46  ;;  %v957_v22 = vmul.f32 %v2515_v50, %v3479_v29  ;;  %v903_v48 = vpop.f32.mrb[37].mxu0 }
 0x549   :  { %v955_v23 = vmul.f32 %v3479_v29, %v903_v48  ;;  %v2516_v21 = vpop.f32.mrb[38].mxu0  ;;  %v999_v5 = vpack.c.bf16 %v984_v45, %v983_v40 }
 0x54a   :  { %v973_v53 = vadd.f32 %v957_v22, %v3426_v9  ;;  %v958_v41 = vmul.f32 %v2516_v21, %v3479_v29  ;;  %v906_v3 = vpop.f32.mrb[39].mxu0 }
 0x54b   :  { %v971_v4 = vadd.f32 %v955_v23, %v3430_v47  ;;  %v956_v26 = vmul.f32 %v3479_v29, %v906_v3  ;;  %2541 = vmatprep.mubr.bf16.mxu1 %v999_v5 }
 0x54c   :  { %v974_v7 = vadd.f32 %v958_v41, %v3434_v13  ;;  %2542 = vmatmul.mubr.bf16.vlgmr.msra.gmra.mrb[32].mxu1 %v1000_v56  ;;  %v989_v10 = vmax.f32 %v973_v53, 0.0 }
 0x54d   :  { %v972_v55 = vadd.f32 %v956_v26, %v3437_v14  ;;  %v987_v24 = vmax.f32 %v971_v4, 0.0 }
 0x54e   :  { %v990_v18 = vmax.f32 %v974_v7, 0.0 }
 0x54f   :  { %v988_v25 = vmax.f32 %v972_v55, 0.0  ;;  %v2519_v43 = vpop.f32.mrb[40].mxu0 }
 0x550   :  { %v961_v9 = vmul.f32 %v2519_v43, %v3479_v29  ;;  %v919_v52 = vpop.f32.mrb[41].mxu0  ;;  %v1002_v15 = vpack.c.bf16 %v990_v18, %v989_v10 }
 0x551   :  { %v959_v37 = vmul.f32 %v3479_v29, %v919_v52  ;;  %v2520_v47 = vpop.f32.mrb[42].mxu0  ;;  %v1001_v31 = vpack.c.bf16 %v988_v25, %v987_v24 }
 0x552   :  { %v977_v39 = vadd.f32 %v961_v9, %v3442_v51  ;;  %v962_v13 = vmul.f32 %v2520_v47, %v3479_v29  ;;  %v922_v54 = vpop.f32.mrb[43].mxu0 }
 0x553   :  { %v975_v14 = vadd.f32 %v959_v37, %v3446_v44  ;;  %v960_v8 = vmul.f32 %v3479_v29, %v922_v54  ;;  %2545 = vmatprep.mubr.bf16.mxu1 %v1001_v31 }
 0x554   :  { %v978_v28 = vadd.f32 %v962_v13, %v3450_v1  ;;  %2546 = vmatmul.mubr.bf16.gmra.mrb[36].mxu1 %v1002_v15  ;;  %v993_v35 = vmax.f32 %v977_v39, 0.0 }
 0x555   :  { %v976_v36 = vadd.f32 %v960_v8, %v3453_v2  ;;  %v991_v17 = vmax.f32 %v975_v14, 0.0 }
 0x556   :  { %v994_v49 = vmax.f32 %v978_v28, 0.0 }
 0x557   :  { %v992_v20 = vmax.f32 %v976_v36, 0.0  ;;  %v2523_v57 = vpop.f32.mrb[44].mxu0 }
 0x558   :  { %v965_v51 = vmul.f32 %v2523_v57, %v3479_v29  ;;  %v935_v33 = vpop.f32.mrb[45].mxu0  ;;  %v1004_v30 = vpack.c.bf16 %v994_v49, %v993_v35 }
 0x559   :  { %v963_v6 = vmul.f32 %v3479_v29, %v935_v33  ;;  %v2524_v44 = vpop.f32.mrb[46].mxu0  ;;  %v1003_v42 = vpack.c.bf16 %v992_v20, %v991_v17 }
 0x55a   :  { %v981_v34 = vadd.f32 %v965_v51, %v3458_v27  ;;  %v966_v1 = vmul.f32 %v2524_v44, %v3479_v29  ;;  %v938_v38 = vpop.f32.mrb[47].mxu0 }
 0x55b   :  { %v979_v2 = vadd.f32 %v963_v6, %v3462_v19  ;;  %v964_v46 = vmul.f32 %v3479_v29, %v938_v38  ;;  %2549 = vmatprep.mubr.bf16.mxu1 %v1003_v42  ;;  %v2171_v19 = vld [vmem:[%s3993_s6] ss:$0 sm:$0xff]  ;;  %s2166_s6 = sld [smem:[#allocation2 + $0x5]]  ;;  %v3575_v42 = vstv %s2167_s19 }
 0x55c   :  { %v982_v12 = vadd.f32 %v966_v1, %v3466_v32  ;;  %2550 = vmatmul.mubr.bf16.gmra.mrb[40].mxu1 %v1004_v30  ;;  %v997_v45 = vmax.f32 %v981_v34, 0.0 }
 0x55d   :  { %v980_v40 = vadd.f32 %v964_v46, %v3469_v11  ;;  %v995_v56 = vmax.f32 %v979_v2, 0.0 }
 0x55e   :  { %v998_v50 = vmax.f32 %v982_v12, 0.0 }
 0x55f   :  { %v996_v22 = vmax.f32 %v980_v40, 0.0 }
 0x560   :  { %v1006_v48 = vpack.c.bf16 %v998_v50, %v997_v45 }
 0x561   :  { %v1005_v23 = vpack.c.bf16 %v996_v22, %v995_v56  ;;  %v3573_v44 = vstv %s2166_s6 }
 0x563   :  { %2553 = vmatprep.mubr.bf16.mxu1 %v1005_v23 }
 0x564   :  { %2554 = vmatmul.mubr.bf16.gmra.mrb[44].mxu1 %v1006_v48 }
 0x565   :  { %2605 = vmatprep.mubr.bf16.mxu1 %v3163_v16 }
 0x61f   :  { %v2543_v27 = vpop.f32.mrb[32].mxu1 }
 0x620   :  { %v1117_v29 = vpop.f32.mrb[33].mxu1  ;;  %v3517_v21 = vadd.f32 %v2543_v27, %v2171_v19 }
 0x621   :  { %v2544_v32 = vpop.f32.mrb[34].mxu1  ;;  %v3521_v53 = vadd.f32 %v2171_v19, %v1117_v29 }
 0x622   :  { %v3519_v11 = vadd.f32 %v2544_v32, %v2171_v19  ;;  %v1120_v5 = vpop.f32.mrb[35].mxu1 }
 0x623   :  { %v3523_v41 = vadd.f32 %v2171_v19, %v1120_v5 }
 0x624   :  { %v1198_v3 = vpack.c.bf16 %v3519_v11, %v3517_v21 }
 0x625   :  { %v1197_v4 = vpack.c.bf16 %v3523_v41, %v3521_v53  ;;  %v1182_v46 = vmul.f32 %v3573_v44, %v3523_v41 }
 0x627   :  { %v2547_v26 = vpop.f32.mrb[36].mxu1  ;;  %2557 = vmatprep.subr.bf16.mxu0 %v1197_v4 }
 0x628   :  { %v1133_v7 = vpop.f32.mrb[37].mxu1  ;;  %2558 = vmatpush3.bf16.msra.mxu0 %v1197_v4  ;;  %v3529_v10 = vadd.f32 %v2547_v26, %v2171_v19 }
 0x629   :  { %v2548_v55 = vpop.f32.mrb[38].mxu1  ;;  %2559 = vmatprep.subr.bf16.mxu0 %v1198_v3  ;;  %v3533_v25 = vadd.f32 %v2171_v19, %v1133_v7 }
 0x62a   :  { %v3531_v18 = vadd.f32 %v2548_v55, %v2171_v19  ;;  %v1136_v24 = vpop.f32.mrb[39].mxu1  ;;  %v1187_v48 = vmul.f32 %v3573_v44, %v3529_v10 }
 0x62b   :  { %v3535_v43 = vadd.f32 %v2171_v19, %v1136_v24 }
 0x62c   :  { %v1200_v9 = vpack.c.bf16 %v3531_v18, %v3529_v10  ;;  %2560 = vmatpush3.bf16.msra.mxu0 %v1198_v3 }
 0x62d   :  { %v1199_v52 = vpack.c.bf16 %v3535_v43, %v3533_v25  ;;  %v1186_v3 = vmul.f32 %v3573_v44, %v3535_v43 }
 0x62f   :  { %v2551_v15 = vpop.f32.mrb[40].mxu1  ;;  %2561 = vmatprep.subr.bf16.mxu0 %v1199_v52 }
 0x630   :  { %v1149_v37 = vpop.f32.mrb[41].mxu1  ;;  %2562 = vmatpush3.bf16.msra.mxu0 %v1199_v52  ;;  %v3541_v31 = vadd.f32 %v2551_v15, %v2171_v19 }
 0x631   :  { %v2552_v47 = vpop.f32.mrb[42].mxu1  ;;  %2563 = vmatprep.subr.bf16.mxu0 %v1200_v9  ;;  %v3545_v54 = vadd.f32 %v2171_v19, %v1149_v37 }
 0x632   :  { %v3543_v39 = vadd.f32 %v2552_v47, %v2171_v19  ;;  %v1152_v13 = vpop.f32.mrb[43].mxu1  ;;  %v1191_v24 = vmul.f32 %v3573_v44, %v3541_v31 }
 0x633   :  { %v3547_v14 = vadd.f32 %v2171_v19, %v1152_v13  ;;  %v1189_v43 = vmul.f32 %v3573_v44, %v3545_v54 }
 0x634   :  { %v1202_v8 = vpack.c.bf16 %v3543_v39, %v3541_v31  ;;  %2564 = vmatpush3.bf16.msra.mxu0 %v1200_v9  ;;  %v1192_v37 = vmul.f32 %v3573_v44, %v3543_v39 }
 0x635   :  { %v1201_v28 = vpack.c.bf16 %v3547_v14, %v3545_v54  ;;  %v1190_v31 = vmul.f32 %v3573_v44, %v3547_v14 }
 0x637   :  { %v2555_v36 = vpop.f32.mrb[44].mxu1  ;;  %2565 = vmatprep.subr.bf16.mxu0 %v1201_v28 }
 0x638   :  { %v1165_v35 = vpop.f32.mrb[45].mxu1  ;;  %2566 = vmatpush3.bf16.msra.mxu0 %v1201_v28  ;;  %v3553_v17 = vadd.f32 %v2555_v36, %v2171_v19 }
 0x639   :  { %v2556_v49 = vpop.f32.mrb[46].mxu1  ;;  %2567 = vmatprep.subr.bf16.mxu0 %v1202_v8  ;;  %v3557_v51 = vadd.f32 %v2171_v19, %v1165_v35 }
 0x63a   :  { %v3555_v20 = vadd.f32 %v2556_v49, %v2171_v19  ;;  %v1168_v57 = vpop.f32.mrb[47].mxu1 }
 0x63b   :  { %v3559_v33 = vadd.f32 %v2171_v19, %v1168_v57  ;;  %v1185_v19 = vmul.f32 %v3573_v44, %v3533_v25  ;;  %v1193_v14 = vmul.f32 %v3573_v44, %v3557_v51 }
 0x63c   :  { %v1204_v30 = vpack.c.bf16 %v3555_v20, %v3553_v17  ;;  %2568 = vmatpush3.bf16.msra.mxu0 %v1202_v8 }
 0x63d   :  { %v1203_v6 = vpack.c.bf16 %v3559_v33, %v3557_v51 }
 0x63f   :  { %2569 = vmatprep.subr.bf16.mxu0 %v1203_v6 }
 0x640   :  { %2570 = vmatpush3.bf16.msra.mxu0 %v1203_v6 }
 0x641   :  { %2571 = vmatprep.subr.bf16.mxu0 %v1204_v30 }
 0x644   :  { %2572 = vmatpush3.bf16.msra.mxu0 %v1204_v30  ;;  %v1195_v30 = vmul.f32 %v3573_v44, %v3553_v17  ;;  %v1194_v17 = vmul.f32 %v3573_v44, %v3559_v33  ;;  %v3663_v33 = vld [vmem:[#allocation7 + $0x18] sm:$0xff]  }
 0x647   :  { %2574 = vmatmul.mubr.bf16.vlgmr.msra.gmra.mrb[48].mxu0 %v3218_v58 }
 0x648   :  { %2577 = vmatprep.mubr.bf16.mxu0 %v3220_v59  ;;  %v1183_v59 = vmul.f32 %v3573_v44, %v3517_v21  ;;  %v1188_v21 = vmul.f32 %v3573_v44, %v3531_v18 }
 0x64f   :  { %2578 = vmatmul.mubr.bf16.gmra.mrb[52].mxu0 %v3224_v60 }
 0x650   :  { %2581 = vmatprep.mubr.bf16.mxu0 %v3226_v61 }
 0x657   :  { %2582 = vmatmul.mubr.bf16.gmra.mrb[56].mxu0 %v3230_v62  ;;  %v1181_v62 = vmul.f32 %v3573_v44, %v3521_v53 }
 0x658   :  { %2585 = vmatprep.mubr.bf16.mxu0 %v3232_v63 }
 0x65f   :  { %2586 = vmatmul.mubr.bf16.gmra.mrb[60].mxu0 %v3236_v0 }
 0x660   :  { %2637 = vmatprep.mubr.bf16.mxu0 %v3163_v16  ;;  %v1184_v16 = vmul.f32 %v3573_v44, %v3519_v11 }
 0x71a   :  { %v2575_v58 = vpop.f32.mrb[48].mxu0 }
 0x71b   :  { %v1305_v60 = vmul.f32 %v2575_v58, %v3575_v42  ;;  %v1239_v61 = vpop.f32.mrb[49].mxu0 }
 0x71c   :  { %v1303_v63 = vmul.f32 %v3575_v42, %v1239_v61  ;;  %v2576_v0 = vpop.f32.mrb[50].mxu0 }
 0x71d   :  { %v3585_v34 = vadd.f32 %v1305_v60, %v1183_v59  ;;  %v1306_v1 = vmul.f32 %v2576_v0, %v3575_v42  ;;  %v1336_v38 = vpack.c.bf16 %v2576_v0, %v2575_v58  ;;  %v1242_v2 = vpop.f32.mrb[51].mxu0 }
 0x71e   :  { %v3590_v12 = vadd.f32 %v1303_v63, %v1181_v62  ;;  %v1304_v40 = vmul.f32 %v3575_v42, %v1242_v2  ;;  %v1335_v45 = vpack.c.bf16 %v1242_v2, %v1239_v61  ;;  %v1196_v61 = vmul.f32 %v3573_v44, %v3555_v20  ;;  %v3657_v20 = vld [vmem:[#allocation7 + $0x8] sm:$0xff]   ;;  %v3666_v44 = vld [vmem:[#allocation7 + $0x20] sm:$0xff]  }
 0x71f   :  { %v3593_v50 = vadd.f32 %v1306_v1, %v1184_v16 }
 0x720   :  { %v3595_v56 = vadd.f32 %v1304_v40, %v1182_v46  ;;  %2589 = vmatprep.subr.bf16.mxu1 %v1335_v45  ;;  %v3660_v40 = vld [vmem:[#allocation7 + $0x10] sm:$0xff]  }
 0x721   :  { %2590 = vmatpush3.bf16.msra.mxu1 %v1335_v45  ;;  %v3672_v45 = vld [vmem:[#allocation7 + $0x30] sm:$0xff]  }
 0x722   :  { %v2579_v22 = vpop.f32.mrb[52].mxu0  ;;  %2591 = vmatprep.subr.bf16.mxu1 %v1336_v38 }
 0x723   :  { %v1309_v23 = vmul.f32 %v2579_v22, %v3575_v42  ;;  %v1255_v27 = vpop.f32.mrb[53].mxu0 }
 0x724   :  { %v1307_v29 = vmul.f32 %v3575_v42, %v1255_v27  ;;  %v2580_v32 = vpop.f32.mrb[54].mxu0 }
 0x725   :  { %v3605_v11 = vadd.f32 %v1309_v23, %v1187_v48  ;;  %v1310_v5 = vmul.f32 %v2580_v32, %v3575_v42  ;;  %v1338_v53 = vpack.c.bf16 %v2580_v32, %v2579_v22  ;;  %v1258_v41 = vpop.f32.mrb[55].mxu0  ;;  %2592 = vmatpush3.bf16.msra.mxu1 %v1336_v38  ;;  %v3675_v22 = vld [vmem:[#allocation7 + $0x38] sm:$0xff]   ;;  %v2855_v48 = vld [vmem:[#allocation7] sm:$0xff]   ;;  %v3678_v23 = vstv %s2168_s20 }
 0x726   :  { %v3610_v4 = vadd.f32 %v1307_v29, %v1185_v19  ;;  %v1308_v26 = vmul.f32 %v3575_v42, %v1258_v41  ;;  %v1337_v7 = vpack.c.bf16 %v1258_v41, %v1255_v27 }
 0x727   :  { %v3613_v55 = vadd.f32 %v1310_v5, %v1188_v21 }
 0x728   :  { %v3615_v10 = vadd.f32 %v1308_v26, %v1186_v3  ;;  %2593 = vmatprep.subr.bf16.mxu1 %v1337_v7 }
 0x729   :  { %2594 = vmatpush3.bf16.msra.mxu1 %v1337_v7 }
 0x72a   :  { %v2583_v18 = vpop.f32.mrb[56].mxu0  ;;  %2595 = vmatprep.subr.bf16.mxu1 %v1338_v53 }
 0x72b   :  { %v1313_v25 = vmul.f32 %v2583_v18, %v3575_v42  ;;  %v1271_v9 = vpop.f32.mrb[57].mxu0 }
 0x72c   :  { %v1311_v52 = vmul.f32 %v3575_v42, %v1271_v9  ;;  %v2584_v15 = vpop.f32.mrb[58].mxu0 }
 0x72d   :  { %v3625_v47 = vadd.f32 %v1313_v25, %v1191_v24  ;;  %v1314_v13 = vmul.f32 %v2584_v15, %v3575_v42  ;;  %v1340_v8 = vpack.c.bf16 %v2584_v15, %v2583_v18  ;;  %v1274_v28 = vpop.f32.mrb[59].mxu0  ;;  %2596 = vmatpush3.bf16.msra.mxu1 %v1338_v53 }
 0x72e   :  { %v3630_v36 = vadd.f32 %v1311_v52, %v1189_v43  ;;  %v1312_v54 = vmul.f32 %v3575_v42, %v1274_v28  ;;  %v1339_v35 = vpack.c.bf16 %v1274_v28, %v1271_v9 }
 0x72f   :  { %v3633_v49 = vadd.f32 %v1314_v13, %v1192_v37 }
 0x730   :  { %v3635_v57 = vadd.f32 %v1312_v54, %v1190_v31  ;;  %2597 = vmatprep.subr.bf16.mxu1 %v1339_v35 }
 0x731   :  { %2598 = vmatpush3.bf16.msra.mxu1 %v1339_v35 }
 0x732   :  { %v2587_v39 = vpop.f32.mrb[60].mxu0  ;;  %2599 = vmatprep.subr.bf16.mxu1 %v1340_v8 }
 0x733   :  { %v1317_v6 = vmul.f32 %v2587_v39, %v3575_v42  ;;  %v1287_v58 = vpop.f32.mrb[61].mxu0 }
 0x734   :  { %v1315_v59 = vmul.f32 %v3575_v42, %v1287_v58  ;;  %v2588_v60 = vpop.f32.mrb[62].mxu0 }
 0x735   :  { %v3645_v62 = vadd.f32 %v1317_v6, %v1195_v30  ;;  %v1318_v63 = vmul.f32 %v2588_v60, %v3575_v42  ;;  %v1342_v0 = vpack.c.bf16 %v2588_v60, %v2587_v39  ;;  %v1290_v16 = vpop.f32.mrb[63].mxu0  ;;  %2600 = vmatpush3.bf16.msra.mxu1 %v1340_v8 }
 0x736   :  { %v3650_v1 = vadd.f32 %v1315_v59, %v1193_v14  ;;  %v1316_v51 = vmul.f32 %v3575_v42, %v1290_v16  ;;  %v1341_v38 = vpack.c.bf16 %v1290_v16, %v1287_v58  ;;  %v3669_v42 = vld [vmem:[#allocation7 + $0x28] sm:$0xff]  }
 0x737   :  { %v3653_v2 = vadd.f32 %v1318_v63, %v1196_v61 }
 0x738   :  { %v3655_v46 = vadd.f32 %v1316_v51, %v1194_v17  ;;  %2601 = vmatprep.subr.bf16.mxu1 %v1341_v38 }
 0x739   :  { %2602 = vmatpush3.bf16.msra.mxu1 %v1341_v38 }
 0x73a   :  { %2603 = vmatprep.subr.bf16.mxu1 %v1342_v0 }
 0x73d   :  { %2604 = vmatpush3.bf16.msra.mxu1 %v1342_v0 }
 0x740   :  { %2606 = vmatmul.mubr.bf16.vlgmr.msra.gmra.mrb[48].mxu1 %v3657_v20 }
 0x741   :  { %2609 = vmatprep.mubr.bf16.mxu1 %v3660_v40 }
 0x748   :  { %2610 = vmatmul.mubr.bf16.gmra.mrb[52].mxu1 %v3663_v33 }
 0x749   :  { %2613 = vmatprep.mubr.bf16.mxu1 %v3666_v44 }
 0x750   :  { %2614 = vmatmul.mubr.bf16.gmra.mrb[56].mxu1 %v3669_v42 }
 0x751   :  { %2617 = vmatprep.mubr.bf16.mxu1 %v3672_v45 }
 0x758   :  { %2618 = vmatmul.mubr.bf16.gmra.mrb[60].mxu1 %v3675_v22 }
 0x759   :  { %2669 = vmatprep.mubr.bf16.mxu1 %v2855_v48 }
 0x813   :  { %v2607_v27 = vpop.f32.mrb[48].mxu1 }
 0x814   :  { %v1443_v19 = vmul.f32 %v2607_v27, %v3678_v23  ;;  %v1377_v29 = vpop.f32.mrb[49].mxu1 }
 0x815   :  { %v1441_v32 = vmul.f32 %v3678_v23, %v1377_v29  ;;  %v2608_v21 = vpop.f32.mrb[50].mxu1 }
 0x816   :  { %v3683_v5 = vadd.f32 %v1443_v19, %v3585_v34  ;;  %v1444_v53 = vmul.f32 %v2608_v21, %v3678_v23  ;;  %v1474_v41 = vpack.c.bf16 %v2608_v21, %v2607_v27  ;;  %v1380_v3 = vpop.f32.mrb[51].mxu1  ;;  %v3771_v21 = vstv %s2169_s23 }
 0x817   :  { %v3687_v26 = vadd.f32 %v1441_v32, %v3590_v12  ;;  %v1442_v7 = vmul.f32 %v3678_v23, %v1380_v3  ;;  %v1473_v18 = vpack.c.bf16 %v1380_v3, %v1377_v29 }
 0x818   :  { %v3691_v24 = vadd.f32 %v1444_v53, %v3593_v50 }
 0x819   :  { %v3694_v25 = vadd.f32 %v1442_v7, %v3595_v56  ;;  %2621 = vmatprep.subr.bf16.mxu0 %v1473_v18 }
 0x81a   :  { %2622 = vmatpush3.bf16.msra.mxu0 %v1473_v18 }
 0x81b   :  { %v2611_v34 = vpop.f32.mrb[52].mxu1  ;;  %2623 = vmatprep.subr.bf16.mxu0 %v1474_v41 }
 0x81c   :  { %v1447_v9 = vmul.f32 %v2611_v34, %v3678_v23  ;;  %v1393_v43 = vpop.f32.mrb[53].mxu1 }
 0x81d   :  { %v1445_v52 = vmul.f32 %v3678_v23, %v1393_v43  ;;  %v2612_v12 = vpop.f32.mrb[54].mxu1 }
 0x81e   :  { %v3699_v15 = vadd.f32 %v1447_v9, %v3605_v11  ;;  %v1448_v37 = vmul.f32 %v2612_v12, %v3678_v23  ;;  %v1476_v50 = vpack.c.bf16 %v2612_v12, %v2611_v34  ;;  %v1396_v13 = vpop.f32.mrb[55].mxu1  ;;  %2624 = vmatpush3.bf16.msra.mxu0 %v1474_v41 }
 0x81f   :  { %v3703_v56 = vadd.f32 %v1445_v52, %v3610_v4  ;;  %v1446_v8 = vmul.f32 %v3678_v23, %v1396_v13  ;;  %v1475_v28 = vpack.c.bf16 %v1396_v13, %v1393_v43 }
 0x820   :  { %v3707_v31 = vadd.f32 %v1448_v37, %v3613_v55 }
 0x821   :  { %v3710_v54 = vadd.f32 %v1446_v8, %v3615_v10  ;;  %2625 = vmatprep.subr.bf16.mxu0 %v1475_v28 }
 0x822   :  { %2626 = vmatpush3.bf16.msra.mxu0 %v1475_v28 }
 0x823   :  { %v2615_v11 = vpop.f32.mrb[56].mxu1  ;;  %2627 = vmatprep.subr.bf16.mxu0 %v1476_v50 }
 0x824   :  { %v1451_v35 = vmul.f32 %v2615_v11, %v3678_v23  ;;  %v1409_v39 = vpop.f32.mrb[57].mxu1 }
 0x825   :  { %v1449_v30 = vmul.f32 %v3678_v23, %v1409_v39  ;;  %v2616_v4 = vpop.f32.mrb[58].mxu1 }
 0x826   :  { %v3715_v6 = vadd.f32 %v1451_v35, %v3625_v47  ;;  %v1452_v58 = vmul.f32 %v2616_v4, %v3678_v23  ;;  %v1478_v55 = vpack.c.bf16 %v2616_v4, %v2615_v11  ;;  %v1412_v14 = vpop.f32.mrb[59].mxu1  ;;  %2628 = vmatpush3.bf16.msra.mxu0 %v1476_v50 }
 0x827   :  { %v3719_v10 = vadd.f32 %v1449_v30, %v3630_v36  ;;  %v1450_v59 = vmul.f32 %v3678_v23, %v1412_v14  ;;  %v1477_v60 = vpack.c.bf16 %v1412_v14, %v1409_v39 }
 0x828   :  { %v3723_v61 = vadd.f32 %v1452_v58, %v3633_v49 }
 0x829   :  { %v3726_v63 = vadd.f32 %v1450_v59, %v3635_v57  ;;  %2629 = vmatprep.subr.bf16.mxu0 %v1477_v60 }
 0x82a   :  { %2630 = vmatpush3.bf16.msra.mxu0 %v1477_v60 }
 0x82b   :  { %v2619_v47 = vpop.f32.mrb[60].mxu1  ;;  %2631 = vmatprep.subr.bf16.mxu0 %v1478_v55 }
 0x82c   :  { %v1455_v0 = vmul.f32 %v2619_v47, %v3678_v23  ;;  %v1425_v16 = vpop.f32.mrb[61].mxu1 }
 0x82d   :  { %v1453_v17 = vmul.f32 %v3678_v23, %v1425_v16  ;;  %v2620_v36 = vpop.f32.mrb[62].mxu1 }
 0x82e   :  { %v3731_v51 = vadd.f32 %v1455_v0, %v3645_v62  ;;  %v1456_v38 = vmul.f32 %v2620_v36, %v3678_v23  ;;  %v1480_v49 = vpack.c.bf16 %v2620_v36, %v2619_v47  ;;  %v1428_v48 = vpop.f32.mrb[63].mxu1  ;;  %2632 = vmatpush3.bf16.msra.mxu0 %v1478_v55  ;;  %v3751_v62 = vld [vmem:[#allocation12] sm:$0xff]  }
 0x82f   :  { %v3735_v57 = vadd.f32 %v1453_v17, %v3650_v1  ;;  %v1454_v27 = vmul.f32 %v3678_v23, %v1428_v48  ;;  %v1479_v19 = vpack.c.bf16 %v1428_v48, %v1425_v16  ;;  %v3753_v1 = vld [vmem:[#allocation12 + $0x8] sm:$0xff]   ;;  %v3766_v23 = vld [vmem:[#allocation12 + $0x20] sm:$0xff]  }
 0x830   :  { %v3739_v29 = vadd.f32 %v1456_v38, %v3653_v2  ;;  %v3758_v2 = vld [vmem:[#allocation12 + $0x10] sm:$0xff]  }
 0x831   :  { %v3742_v32 = vadd.f32 %v1454_v27, %v3655_v46  ;;  %2633 = vmatprep.subr.bf16.mxu0 %v1479_v19  ;;  %v3762_v46 = vld [vmem:[#allocation12 + $0x18] sm:$0xff]  }
 0x832   :  { %2634 = vmatpush3.bf16.msra.mxu0 %v1479_v19 }
 0x833   :  { %2635 = vmatprep.subr.bf16.mxu0 %v1480_v49 }
 0x836   :  { %2636 = vmatpush3.bf16.msra.mxu0 %v1480_v49 }
 0x837   :  { %2685 = vmatprep.subr.bf16.mxu0 %v3751_v62 }
 0x839   :  { %2638 = vmatmul.mubr.bf16.vlgmr.msra.gmra.mrb[64].mxu0 %v3657_v20 }
 0x83a   :  { %2641 = vmatprep.mubr.bf16.mxu0 %v3660_v40  ;;  %2686 = vmatpush3.bf16.msra.mxu0 %v3751_v62 }
 0x83b   :  { %2687 = vmatprep.subr.bf16.mxu0 %v3753_v1 }
 0x83e   :  { %2688 = vmatpush3.bf16.msra.mxu0 %v3753_v1 }
 0x83f   :  { %2689 = vmatprep.subr.bf16.mxu0 %v3758_v2 }
 0x841   :  { %2642 = vmatmul.mubr.bf16.gmra.mrb[68].mxu0 %v3663_v33 }
 0x842   :  { %2645 = vmatprep.mubr.bf16.mxu0 %v3666_v44  ;;  %2690 = vmatpush3.bf16.msra.mxu0 %v3758_v2 }
 0x843   :  { %2691 = vmatprep.subr.bf16.mxu0 %v3762_v46 }
 0x846   :  { %2692 = vmatpush3.bf16.msra.mxu0 %v3762_v46 }
 0x847   :  { %2693 = vmatprep.subr.bf16.mxu0 %v3766_v23 }
 0x849   :  { %2646 = vmatmul.mubr.bf16.gmra.mrb[72].mxu0 %v3669_v42 }
 0x84a   :  { %2649 = vmatprep.mubr.bf16.mxu0 %v3672_v45  ;;  %2694 = vmatpush3.bf16.msra.mxu0 %v3766_v23 }
 0x851   :  { %2650 = vmatmul.mubr.bf16.gmra.mrb[76].mxu0 %v3675_v22 }
 0x90c   :  { %v2639_v53 = vpop.f32.mrb[64].mxu0 }
 0x90d   :  { %v1581_v41 = vmul.f32 %v2639_v53, %v3771_v21  ;;  %v1515_v3 = vpop.f32.mrb[65].mxu0 }
 0x90e   :  { %v1579_v7 = vmul.f32 %v3771_v21, %v1515_v3  ;;  %v2640_v18 = vpop.f32.mrb[66].mxu0 }
 0x90f   :  { %v3776_v34 = vadd.f32 %v1581_v41, %v3683_v5  ;;  %v1582_v9 = vmul.f32 %v2640_v18, %v3771_v21  ;;  %v1612_v43 = vpack.c.bf16 %v2640_v18, %v2639_v53  ;;  %v1518_v52 = vpop.f32.mrb[67].mxu0 }
 0x910   :  { %v3780_v12 = vadd.f32 %v1579_v7, %v3687_v26  ;;  %v1580_v37 = vmul.f32 %v3771_v21, %v1518_v52  ;;  %v1611_v50 = vpack.c.bf16 %v1518_v52, %v1515_v3 }
 0x911   :  { %v3784_v13 = vadd.f32 %v1582_v9, %v3691_v24 }
 0x912   :  { %v3787_v8 = vadd.f32 %v1580_v37, %v3694_v25  ;;  %2653 = vmatprep.subr.bf16.mxu1 %v1611_v50 }
 0x913   :  { %2654 = vmatpush3.bf16.msra.mxu1 %v1611_v50 }
 0x914   :  { %v2643_v5 = vpop.f32.mrb[68].mxu0  ;;  %2655 = vmatprep.subr.bf16.mxu1 %v1612_v43 }
 0x915   :  { %v1585_v28 = vmul.f32 %v2643_v5, %v3771_v21  ;;  %v1531_v11 = vpop.f32.mrb[69].mxu0 }
 0x916   :  { %v1583_v35 = vmul.f32 %v3771_v21, %v1531_v11  ;;  %v2644_v26 = vpop.f32.mrb[70].mxu0 }
 0x917   :  { %v3792_v39 = vadd.f32 %v1585_v28, %v3699_v15  ;;  %v1586_v30 = vmul.f32 %v2644_v26, %v3771_v21  ;;  %v1614_v24 = vpack.c.bf16 %v2644_v26, %v2643_v5  ;;  %v1534_v4 = vpop.f32.mrb[71].mxu0  ;;  %2656 = vmatpush3.bf16.msra.mxu1 %v1612_v43 }
 0x918   :  { %v3796_v25 = vadd.f32 %v1583_v35, %v3703_v56  ;;  %v1584_v58 = vmul.f32 %v3771_v21, %v1534_v4  ;;  %v1613_v55 = vpack.c.bf16 %v1534_v4, %v1531_v11 }
 0x919   :  { %v3800_v14 = vadd.f32 %v1586_v30, %v3707_v31 }
 0x91a   :  { %v3803_v59 = vadd.f32 %v1584_v58, %v3710_v54  ;;  %2657 = vmatprep.subr.bf16.mxu1 %v1613_v55 }
 0x91b   :  { %2658 = vmatpush3.bf16.msra.mxu1 %v1613_v55 }
 0x91c   :  { %v2647_v15 = vpop.f32.mrb[72].mxu0  ;;  %2659 = vmatprep.subr.bf16.mxu1 %v1614_v24 }
 0x91d   :  { %v1589_v60 = vmul.f32 %v2647_v15, %v3771_v21  ;;  %v1547_v47 = vpop.f32.mrb[73].mxu0 }
 0x91e   :  { %v1587_v0 = vmul.f32 %v3771_v21, %v1547_v47  ;;  %v2648_v56 = vpop.f32.mrb[74].mxu0 }
 0x91f   :  { %v3808_v16 = vadd.f32 %v1589_v60, %v3715_v6  ;;  %v1590_v17 = vmul.f32 %v2648_v56, %v3771_v21  ;;  %v1616_v31 = vpack.c.bf16 %v2648_v56, %v2647_v15  ;;  %v1550_v36 = vpop.f32.mrb[75].mxu0  ;;  %2660 = vmatpush3.bf16.msra.mxu1 %v1614_v24 }
 0x920   :  { %v3812_v54 = vadd.f32 %v1587_v0, %v3719_v10  ;;  %v1588_v38 = vmul.f32 %v3771_v21, %v1550_v36  ;;  %v1615_v49 = vpack.c.bf16 %v1550_v36, %v1547_v47 }
 0x921   :  { %v3816_v48 = vadd.f32 %v1590_v17, %v3723_v61 }
 0x922   :  { %v3819_v27 = vadd.f32 %v1588_v38, %v3726_v63  ;;  %2661 = vmatprep.subr.bf16.mxu1 %v1615_v49 }
 0x923   :  { %2662 = vmatpush3.bf16.msra.mxu1 %v1615_v49 }
 0x924   :  { %v2651_v6 = vpop.f32.mrb[76].mxu0  ;;  %2663 = vmatprep.subr.bf16.mxu1 %v1616_v31 }
 0x925   :  { %v1593_v19 = vmul.f32 %v2651_v6, %v3771_v21  ;;  %v1563_v53 = vpop.f32.mrb[77].mxu0 }
 0x926   :  { %v1591_v41 = vmul.f32 %v3771_v21, %v1563_v53  ;;  %v2652_v10 = vpop.f32.mrb[78].mxu0 }
 0x927   :  { %v3824_v3 = vadd.f32 %v1593_v19, %v3731_v51  ;;  %v1594_v7 = vmul.f32 %v2652_v10, %v3771_v21  ;;  %v1618_v61 = vpack.c.bf16 %v2652_v10, %v2651_v6  ;;  %v1566_v18 = vpop.f32.mrb[79].mxu0  ;;  %2664 = vmatpush3.bf16.msra.mxu1 %v1616_v31 }
 0x928   :  { %v3828_v63 = vadd.f32 %v1591_v41, %v3735_v57  ;;  %v1592_v9 = vmul.f32 %v3771_v21, %v1566_v18  ;;  %v1617_v43 = vpack.c.bf16 %v1566_v18, %v1563_v53 }
 0x929   :  { %v3832_v52 = vadd.f32 %v1594_v7, %v3739_v29 }
 0x92a   :  { %v3835_v37 = vadd.f32 %v1592_v9, %v3742_v32  ;;  %2665 = vmatprep.subr.bf16.mxu1 %v1617_v43 }
 0x92b   :  { %2666 = vmatpush3.bf16.msra.mxu1 %v1617_v43 }
 0x92c   :  { %2667 = vmatprep.subr.bf16.mxu1 %v1618_v61 }
 0x92f   :  { %2668 = vmatpush3.bf16.msra.mxu1 %v1618_v61 }
 0x930   :  { %2717 = vmatprep.subr.bf16.mxu1 %v3751_v62 }
 0x932   :  { %2670 = vmatmul.mubr.bf16.vlgmr.msra.gmra.mrb[64].mxu1 %v3657_v20  ;;  %v2781_v20 = vld [vmem:[#allocation12 + $0x28] sm:$0xff]  }
 0x933   :  { %2673 = vmatprep.mubr.bf16.mxu1 %v3660_v40  ;;  %2725 = vmatpush3.bf16.msra.mxu1 %v3751_v62  ;;  %v2782_v40 = vld [vmem:[#allocation12 + $0x30] sm:$0xff]  }
 0x934   :  { %2718 = vmatprep.subr.bf16.mxu1 %v3753_v1  ;;  %2695 = vmatprep.subr.bf16.mxu0 %v2781_v20 }
 0x935   :  { %2696 = vmatpush3.bf16.msra.mxu0 %v2781_v20 }
 0x936   :  { %2697 = vmatprep.subr.bf16.mxu0 %v2782_v40 }
 0x937   :  { %2726 = vmatpush3.bf16.msra.mxu1 %v3753_v1 }
 0x938   :  { %2719 = vmatprep.subr.bf16.mxu1 %v3758_v2 }
 0x939   :  { %2698 = vmatpush3.bf16.msra.mxu0 %v2782_v40 }
 0x93a   :  { %2674 = vmatmul.mubr.bf16.gmra.mrb[68].mxu1 %v3663_v33  ;;  %v2783_v33 = vld [vmem:[#allocation12 + $0x38] sm:$0xff]  }
 0x93b   :  { %2677 = vmatprep.mubr.bf16.mxu1 %v3666_v44  ;;  %2727 = vmatpush3.bf16.msra.mxu1 %v3758_v2  ;;  %v3854_v44 = vstv %s2170_s24 }
 0x93c   :  { %2720 = vmatprep.subr.bf16.mxu1 %v3762_v46  ;;  %2699 = vmatprep.subr.bf16.mxu0 %v2783_v33 }
 0x93d   :  { %2700 = vmatpush3.bf16.msra.mxu0 %v2783_v33 }
 0x93f   :  { %2728 = vmatpush3.bf16.msra.mxu1 %v3762_v46 }
 0x940   :  { %2721 = vmatprep.subr.bf16.mxu1 %v3766_v23 }
 0x942   :  { %2678 = vmatmul.mubr.bf16.gmra.mrb[72].mxu1 %v3669_v42 }
 0x943   :  { %2681 = vmatprep.mubr.bf16.mxu1 %v3672_v45  ;;  %2729 = vmatpush3.bf16.msra.mxu1 %v3766_v23 }
 0x944   :  { %2722 = vmatprep.subr.bf16.mxu1 %v2781_v20 }
 0x947   :  { %2730 = vmatpush3.bf16.msra.mxu1 %v2781_v20 }
 0x948   :  { %2723 = vmatprep.subr.bf16.mxu1 %v2782_v40 }
 0x94a   :  { %2682 = vmatmul.mubr.bf16.gmra.mrb[76].mxu1 %v3675_v22 }
 0x94b   :  { %2731 = vmatpush3.bf16.msra.mxu1 %v2782_v40 }
 0x94c   :  { %2724 = vmatprep.subr.bf16.mxu1 %v2783_v33 }
 0x94f   :  { %2732 = vmatpush3.bf16.msra.mxu1 %v2783_v33 }
 0xa05   :  { %v2671_v42 = vpop.f32.mrb[64].mxu1 }
 0xa06   :  { %v1719_v45 = vmul.f32 %v2671_v42, %v3854_v44  ;;  %v1653_v22 = vpop.f32.mrb[65].mxu1 }
 0xa07   :  { %v1717_v51 = vmul.f32 %v3854_v44, %v1653_v22  ;;  %v2672_v57 = vpop.f32.mrb[66].mxu1 }
 0xa08   :  { %v1735_v29 = vadd.f32 %v1719_v45, %v3776_v34  ;;  %v1720_v32 = vmul.f32 %v2672_v57, %v3854_v44  ;;  %v1656_v62 = vpop.f32.mrb[67].mxu1 }
 0xa09   :  { %v1733_v1 = vadd.f32 %v1717_v51, %v3780_v12  ;;  %v1718_v2 = vmul.f32 %v3854_v44, %v1656_v62 }
 0xa0a   :  { %v1736_v46 = vadd.f32 %v1720_v32, %v3784_v13  ;;  %v1751_v21 = vmax.f32 %v1735_v29, 0.0 }
 0xa0b   :  { %v1734_v23 = vadd.f32 %v1718_v2, %v3787_v8  ;;  %v1749_v5 = vmax.f32 %v1733_v1, 0.0 }
 0xa0c   :  { %v1752_v50 = vmax.f32 %v1736_v46, 0.0 }
 0xa0d   :  { %v1750_v28 = vmax.f32 %v1734_v23, 0.0  ;;  %v2675_v11 = vpop.f32.mrb[68].mxu1 }
 0xa0e   :  { %v1766_v35 = vpack.c.bf16 %v1752_v50, %v1751_v21  ;;  %v1723_v26 = vmul.f32 %v2675_v11, %v3854_v44  ;;  %v1669_v34 = vpop.f32.mrb[69].mxu1 }
 0xa0f   :  { %v1721_v30 = vmul.f32 %v3854_v44, %v1669_v34  ;;  %v2676_v24 = vpop.f32.mrb[70].mxu1  ;;  %v1765_v4 = vpack.c.bf16 %v1750_v28, %v1749_v5 }
 0xa10   :  { %v1739_v12 = vadd.f32 %v1723_v26, %v3792_v39  ;;  %v1724_v58 = vmul.f32 %v2676_v24, %v3854_v44  ;;  %v1672_v13 = vpop.f32.mrb[71].mxu1 }
 0xa11   :  { %v1737_v8 = vadd.f32 %v1721_v30, %v3796_v25  ;;  %v1722_v55 = vmul.f32 %v3854_v44, %v1672_v13  ;;  %2701 = vmatprep.mubr.bf16.mxu0 %v1765_v4 }
 0xa12   :  { %v1740_v15 = vadd.f32 %v1724_v58, %v3800_v14  ;;  %2702 = vmatmul.mubr.bf16.vlgmr.msra.gmra.mrb[80].mxu0 %v1766_v35  ;;  %v1755_v47 = vmax.f32 %v1739_v12, 0.0 }
 0xa13   :  { %v1738_v60 = vadd.f32 %v1722_v55, %v3803_v59  ;;  %v1753_v56 = vmax.f32 %v1737_v8, 0.0 }
 0xa14   :  { %v1756_v0 = vmax.f32 %v1740_v15, 0.0 }
 0xa15   :  { %v1754_v17 = vmax.f32 %v1738_v60, 0.0  ;;  %v2679_v31 = vpop.f32.mrb[72].mxu1 }
 0xa16   :  { %v1727_v39 = vmul.f32 %v2679_v31, %v3854_v44  ;;  %v1685_v36 = vpop.f32.mrb[73].mxu1  ;;  %v1768_v38 = vpack.c.bf16 %v1756_v0, %v1755_v47 }
 0xa17   :  { %v1725_v49 = vmul.f32 %v3854_v44, %v1685_v36  ;;  %v2680_v25 = vpop.f32.mrb[74].mxu1  ;;  %v1767_v6 = vpack.c.bf16 %v1754_v17, %v1753_v56 }
 0xa18   :  { %v1743_v19 = vadd.f32 %v1727_v39, %v3808_v16  ;;  %v1728_v14 = vmul.f32 %v2680_v25, %v3854_v44  ;;  %v1688_v53 = vpop.f32.mrb[75].mxu1 }
 0xa19   :  { %v1741_v59 = vadd.f32 %v1725_v49, %v3812_v54  ;;  %v1726_v41 = vmul.f32 %v3854_v44, %v1688_v53  ;;  %2705 = vmatprep.mubr.bf16.mxu0 %v1767_v6 }
 0xa1a   :  { %v1744_v10 = vadd.f32 %v1728_v14, %v3816_v48  ;;  %2706 = vmatmul.mubr.bf16.gmra.mrb[84].mxu0 %v1768_v38  ;;  %v1759_v61 = vmax.f32 %v1743_v19, 0.0 }
 0xa1b   :  { %v1742_v7 = vadd.f32 %v1726_v41, %v3819_v27  ;;  %v1757_v9 = vmax.f32 %v1741_v59, 0.0 }
 0xa1c   :  { %v1760_v18 = vmax.f32 %v1744_v10, 0.0 }
 0xa1d   :  { %v1758_v43 = vmax.f32 %v1742_v7, 0.0  ;;  %v2683_v20 = vpop.f32.mrb[76].mxu1 }
 0xa1e   :  { %v1770_v40 = vpack.c.bf16 %v1760_v18, %v1759_v61  ;;  %v1731_v16 = vmul.f32 %v2683_v20, %v3854_v44  ;;  %v1701_v33 = vpop.f32.mrb[77].mxu1 }
 0xa1f   :  { %v1729_v42 = vmul.f32 %v3854_v44, %v1701_v33  ;;  %v2684_v54 = vpop.f32.mrb[78].mxu1  ;;  %v1769_v45 = vpack.c.bf16 %v1758_v43, %v1757_v9 }
 0xa20   :  { %v1747_v22 = vadd.f32 %v1731_v16, %v3824_v3  ;;  %v1732_v48 = vmul.f32 %v2684_v54, %v3854_v44  ;;  %v1704_v51 = vpop.f32.mrb[79].mxu1  ;;  %v2180_v3 = vld [vmem:[%s3995_s8] ss:$0 sm:$0xff]  ;;  %s3016_s8 = smov [#allocation13]  }
 0xa21   :  { %v1745_v27 = vadd.f32 %v1729_v42, %v3828_v63  ;;  %v1730_v57 = vmul.f32 %v3854_v44, %v1704_v51  ;;  %2709 = vmatprep.mubr.bf16.mxu1 %v1769_v45  ;;  %s2122_s5 = sshll.u32 %s3016_s8, 4  ;;  %s2123_s5 = int_to_ptr.vmem [resolvable:$true] %s2122_s5 }
 0xa22   :  { %v1748_v29 = vadd.f32 %v1732_v48, %v3832_v52  ;;  %2710 = vmatmul.mubr.bf16.vlgmr.msra.gmra.mrb[80].mxu1 %v1770_v40  ;;  %v1763_v62 = vmax.f32 %v1747_v22, 0.0  ;;  %s2976_s12 = scalar_lea.vmem %s2123_s5, 2048  ;;  %p2981_p2 = scmp.lt.s32.totalorder %s2123_s5, %s2123_s5 }
 0xa23   :  { %v1746_v32 = vadd.f32 %v1730_v57, %v3835_v37  ;;  %v1761_v2 = vmax.f32 %v1745_v27, 0.0  ;;  %p2977_p1 = scmp.ne.s32.totalorder %s2123_s5, %s2976_s12  ;;  %p2982_p3 = scmp.lt.s32.totalorder %s2976_s12, %s2976_s12 }
 0xa24   :  { %v1764_v1 = vmax.f32 %v1748_v29, 0.0 }
 0xa25   :  { %v1762_v46 = vmax.f32 %v1746_v32, 0.0  ;;  %p2983_p4 = por %p2982_p3, %p2981_p2 }
 0xa26   :  { %v1772_v23 = vpack.c.bf16 %v1764_v1, %v1763_v62 }
 0xa27   :  { %v1771_v21 = vpack.c.bf16 %v1762_v46, %v1761_v2  ;;  %p2984_p5 = pnand %p2983_p4, %p2977_p1 }
 0xa29   :  { %2713 = vmatprep.mubr.bf16.mxu1 %v1771_v21 }
 0xa2a   :  { %2714 = vmatmul.mubr.bf16.gmra.mrb[84].mxu1 %v1772_v23 }
 0xae5   :  { %v2703_v63 = vpop.f32.mrb[80].mxu0 }
 0xae6   :  { %v1887_v44 = vadd.f32 %v2703_v63, %v2180_v3  ;;  %v1878_v50 = vpop.f32.mrb[81].mxu0 }
 0xae7   :  { %v1879_v5 = vadd.f32 %v2180_v3, %v1878_v50  ;;  %v2704_v52 = vpop.f32.mrb[82].mxu0 }
 0xae8   :  { %1945 = vmax.xlane.f32.xlu1 %v1887_v44  ;;  %v1881_v28 = vpop.f32.mrb[83].mxu0  ;;  %v1890_v37 = vadd.f32 %v2704_v52, %v2180_v3 }
 0xae9   :  { %1941 = vmax.xlane.f32.xlu0 %v1879_v5  ;;  %v1882_v11 = vadd.f32 %v2180_v3, %v1881_v28 }
 0xaec   :  { %1947 = vmax.xlane.f32.xlu1 %v1890_v37 }
 0xaed   :  { %1943 = vmax.xlane.f32.xlu0 %v1882_v11  ;;  %v2707_v35 = vpop.f32.mrb[84].mxu0 }
 0xaee   :  { %v1903_v26 = vadd.f32 %v2707_v35, %v2180_v3  ;;  %v1894_v34 = vpop.f32.mrb[85].mxu0 }
 0xaef   :  { %v2708_v30 = vpop.f32.mrb[86].mxu0  ;;  %v1895_v12 = vadd.f32 %v2180_v3, %v1894_v34 }
 0xaf0   :  { %v1906_v24 = vadd.f32 %v2708_v30, %v2180_v3  ;;  %v1897_v4 = vpop.f32.mrb[87].mxu0 }
 0xaf1   :  { %1953 = vmax.xlane.f32.xlu0 %v1903_v26  ;;  %v1898_v58 = vadd.f32 %v2180_v3, %v1897_v4 }
 0xaf2   :  { %1955 = vmax.xlane.f32.xlu1 %v1906_v24 }
 0xaf5   :  { %1949 = vmax.xlane.f32.xlu0 %v1895_v12  ;;  %v2711_v13 = vpop.f32.mrb[80].mxu1 }
 0xaf6   :  { %v1919_v8 = vadd.f32 %v2711_v13, %v2180_v3  ;;  %1951 = vmax.xlane.f32.xlu1 %v1898_v58  ;;  %v1910_v55 = vpop.f32.mrb[81].mxu1 }
 0xaf7   :  { %v2712_v15 = vpop.f32.mrb[82].mxu1  ;;  %v1911_v0 = vadd.f32 %v2180_v3, %v1910_v55 }
 0xaf8   :  { %v1922_v60 = vadd.f32 %v2712_v15, %v2180_v3  ;;  %v1913_v47 = vpop.f32.mrb[83].mxu1 }
 0xaf9   :  { %1961 = vmax.xlane.f32.xlu0 %v1919_v8  ;;  %v3891_v56 = vadd.f32 %v2180_v3, %v1913_v47 }
 0xafa   :  { %1963 = vmax.xlane.f32.xlu1 %v1922_v60 }
 0xafd   :  { %1957 = vmax.xlane.f32.xlu0 %v1911_v0  ;;  %v2715_v17 = vpop.f32.mrb[84].mxu1 }
 0xafe   :  { %1959 = vmax.xlane.f32.xlu1 %v3891_v56  ;;  %v1926_v31 = vpop.f32.mrb[85].mxu1  ;;  %v3899_v25 = vadd.f32 %v2715_v17, %v2180_v3 }
 0xaff   :  { %v3894_v39 = vadd.f32 %v2180_v3, %v1926_v31  ;;  %v2716_v36 = vpop.f32.mrb[86].mxu1 }
 0xb00   :  { %v1929_v38 = vpop.f32.mrb[87].mxu1  ;;  %v3902_v6 = vadd.f32 %v2716_v36, %v2180_v3 }
 0xb01   :  { %v3896_v49 = vadd.f32 %v2180_v3, %v1929_v38  ;;  %1965 = vmax.xlane.f32.xlu0 %v3894_v39 }
 0xb03   :  { %1967 = vmax.xlane.f32.xlu1 %v3896_v49 }
 0xb05   :  { %1969 = vmax.xlane.f32.xlu0 %v3899_v25 }
 0xb07   :  { %1971 = vmax.xlane.f32.xlu1 %v3902_v6 }
 0xb75   :  { %v1946_v19 = vpop.xlane.xlu1 %1945 }
 0xb76   :  { %v3906_v14 = vsub.f32 %v1887_v44, %v1946_v19  ;;  %v1942_v53 = vpop.xlane.xlu0 %1941 }
 0xb77   :  { %v3908_v59 = vsub.f32 %v1879_v5, %v1942_v53 }
 0xb78   :  { %v1993_v41 = vmul.f32 1.442695, %v3906_v14 }
 0xb79   :  { %v1989_v10 = vmul.f32 1.442695, %v3908_v59  ;;  %v1948_v7 = vpop.xlane.xlu1 %1947 }
 0xb7a   :  { %2784 = vpow2.f32 %v1993_v41  ;;  %v3912_v61 = vsub.f32 %v1890_v37, %v1948_v7  ;;  %v1944_v18 = vpop.xlane.xlu0 %1943 }
 0xb7b   :  { %v3914_v9 = vsub.f32 %v1882_v11, %v1944_v18  ;;  %2786 = vpow2.f32 %v1989_v10 }
 0xb7c   :  { %v1995_v43 = vmul.f32 1.442695, %v3912_v61 }
 0xb7d   :  { %v1991_v20 = vmul.f32 1.442695, %v3914_v9 }
 0xb7e   :  { %2788 = vpow2.f32 %v1995_v43  ;;  %v1954_v40 = vpop.xlane.xlu0 %1953 }
 0xb7f   :  { %v3918_v16 = vsub.f32 %v1903_v26, %v1954_v40  ;;  %v1956_v33 = vpop.xlane.xlu1 %1955  ;;  %2790 = vpow2.f32 %v1991_v20 }
 0xb80   :  { %v3920_v42 = vsub.f32 %v1906_v24, %v1956_v33 }
 0xb81   :  { %v2001_v54 = vmul.f32 1.442695, %v3918_v16 }
 0xb82   :  { %v2003_v45 = vmul.f32 1.442695, %v3920_v42  ;;  %v1950_v22 = vpop.xlane.xlu0 %1949 }
 0xb83   :  { %2792 = vpow2.f32 %v2001_v54  ;;  %v3924_v48 = vsub.f32 %v1895_v12, %v1950_v22  ;;  %v1952_v51 = vpop.xlane.xlu1 %1951 }
 0xb84   :  { %v2785_v27 = vpop.eup %2784  ;;  %v3926_v57 = vsub.f32 %v1898_v58, %v1952_v51  ;;  %2794 = vpow2.f32 %v2003_v45 }
 0xb85   :  { %v1997_v29 = vmul.f32 1.442695, %v3924_v48  ;;  %2025 = vadd.xlane.f32.xlu0 %v2785_v27  ;;  %v2787_v1 = vpop.eup %2786 }
 0xb86   :  { %v1999_v32 = vmul.f32 1.442695, %v3926_v57  ;;  %v1962_v62 = vpop.xlane.xlu0 %1961 }
 0xb87   :  { %2796 = vpow2.f32 %v1997_v29  ;;  %v3930_v2 = vsub.f32 %v1919_v8, %v1962_v62  ;;  %v1964_v46 = vpop.xlane.xlu1 %1963 }
 0xb88   :  { %v2789_v23 = vpop.eup %2788  ;;  %v3932_v21 = vsub.f32 %v1922_v60, %v1964_v46  ;;  %2798 = vpow2.f32 %v1999_v32 }
 0xb89   :  { %v2009_v3 = vmul.f32 1.442695, %v3930_v2  ;;  %2027 = vadd.xlane.f32.xlu1 %v2789_v23  ;;  %2021 = vadd.xlane.f32.xlu0 %v2787_v1  ;;  %v2791_v52 = vpop.eup %2790 }
 0xb8a   :  { %v2011_v63 = vmul.f32 1.442695, %v3932_v21  ;;  %v1958_v44 = vpop.xlane.xlu0 %1957 }
 0xb8b   :  { %2800 = vpow2.f32 %v2009_v3  ;;  %v3936_v50 = vsub.f32 %v1911_v0, %v1958_v44  ;;  %v1960_v5 = vpop.xlane.xlu1 %1959 }
 0xb8c   :  { %v3939_v28 = vsub.f32 %v3891_v56, %v1960_v5  ;;  %2802 = vpow2.f32 %v2011_v63 }
 0xb8d   :  { %v2793_v37 = vpop.eup %2792  ;;  %v2005_v11 = vmul.f32 1.442695, %v3936_v50  ;;  %2023 = vadd.xlane.f32.xlu1 %v2791_v52 }
 0xb8e   :  { %v2007_v35 = vmul.f32 1.442695, %v3939_v28  ;;  %2033 = vadd.xlane.f32.xlu0 %v2793_v37  ;;  %v1966_v26 = vpop.xlane.xlu0 %1965  ;;  %v2795_v30 = vpop.eup %2794 }
 0xb8f   :  { %2804 = vpow2.f32 %v2005_v11  ;;  %v3944_v34 = vsub.f32 %v3894_v39, %v1966_v26 }
 0xb90   :  { %v1968_v24 = vpop.xlane.xlu1 %1967  ;;  %2806 = vpow2.f32 %v2007_v35 }
 0xb91   :  { %v2797_v4 = vpop.eup %2796  ;;  %v2013_v12 = vmul.f32 1.442695, %v3944_v34  ;;  %v3948_v58 = vsub.f32 %v3896_v49, %v1968_v24  ;;  %2035 = vadd.xlane.f32.xlu1 %v2795_v30 }
 0xb92   :  { %2029 = vadd.xlane.f32.xlu0 %v2797_v4  ;;  %v1970_v13 = vpop.xlane.xlu0 %1969  ;;  %v2799_v15 = vpop.eup %2798 }
 0xb93   :  { %2808 = vpow2.f32 %v2013_v12  ;;  %v2015_v8 = vmul.f32 1.442695, %v3948_v58  ;;  %v3952_v55 = vsub.f32 %v3899_v25, %v1970_v13 }
 0xb94   :  { %v1972_v60 = vpop.xlane.xlu1 %1971 }
 0xb95   :  { %v2801_v47 = vpop.eup %2800  ;;  %2810 = vpow2.f32 %v2015_v8  ;;  %v2017_v0 = vmul.f32 1.442695, %v3952_v55  ;;  %v3956_v56 = vsub.f32 %v3902_v6, %v1972_v60  ;;  %2031 = vadd.xlane.f32.xlu1 %v2799_v15 }
 0xb96   :  { %2041 = vadd.xlane.f32.xlu0 %v2801_v47  ;;  %v2803_v31 = vpop.eup %2802 }
 0xb97   :  { %2812 = vpow2.f32 %v2017_v0  ;;  %v2019_v17 = vmul.f32 1.442695, %v3956_v56 }
 0xb99   :  { %v2805_v39 = vpop.eup %2804  ;;  %2814 = vpow2.f32 %v2019_v17  ;;  %2043 = vadd.xlane.f32.xlu1 %v2803_v31 }
 0xb9a   :  { %2037 = vadd.xlane.f32.xlu0 %v2805_v39  ;;  %v2807_v36 = vpop.eup %2806 }
 0xb9d   :  { %v2809_v38 = vpop.eup %2808  ;;  %2039 = vadd.xlane.f32.xlu1 %v2807_v36 }
 0xb9e   :  { %2045 = vadd.xlane.f32.xlu0 %v2809_v38 }
 0xb9f   :  { %v2811_v49 = vpop.eup %2810 }
 0xba1   :  { %v2813_v25 = vpop.eup %2812  ;;  %2047 = vadd.xlane.f32.xlu1 %v2811_v49 }
 0xba2   :  { %2049 = vadd.xlane.f32.xlu0 %v2813_v25 }
 0xba3   :  { %v2815_v6 = vpop.eup %2814 }
 0xba5   :  { %2051 = vadd.xlane.f32.xlu1 %v2815_v6 }
 0xc12   :  { %v2026_v19 = vpop.xlane.xlu0 %2025 }
 0xc13   :  { %2816 = vlog2.f32 %v2026_v19 }
 0xc16   :  { %v2028_v53 = vpop.xlane.xlu1 %2027  ;;  %v2022_v41 = vpop.xlane.xlu0 %2021 }
 0xc17   :  { %2818 = vlog2.f32 %v2028_v53 }
 0xc18   :  { %2820 = vlog2.f32 %v2022_v41 }
 0xc1a   :  { %v2024_v10 = vpop.xlane.xlu1 %2023 }
 0xc1b   :  { %2822 = vlog2.f32 %v2024_v10  ;;  %v2034_v7 = vpop.xlane.xlu0 %2033 }
 0xc1c   :  { %2824 = vlog2.f32 %v2034_v7 }
 0xc1d   :  { %v2817_v18 = vpop.eup %2816 }
 0xc1e   :  { %v2058_v43 = vmul.f32 0.6931472, %v2817_v18  ;;  %v2036_v20 = vpop.xlane.xlu1 %2035 }
 0xc1f   :  { %2826 = vlog2.f32 %v2036_v20  ;;  %v2030_v40 = vpop.xlane.xlu0 %2029 }
 0xc20   :  { %v2087_v33 = vsub.f32 %v3906_v14, %v2058_v43  ;;  %2828 = vlog2.f32 %v2030_v40 }
 0xc21   :  { %v2819_v54 = vpop.eup %2818 }
 0xc22   :  { %v2821_v45 = vpop.eup %2820  ;;  %2103 = vst [vmem:[#allocation13 + $0x10] sm:$0xff] %v2087_v33  ;;  %v2060_v22 = vmul.f32 0.6931472, %v2819_v54  ;;  %v2032_v51 = vpop.xlane.xlu1 %2031 }
 0xc23   :  { %v2054_v27 = vmul.f32 0.6931472, %v2821_v45  ;;  %2830 = vlog2.f32 %v2032_v51  ;;  %v2042_v29 = vpop.xlane.xlu0 %2041 }
 0xc24   :  { %v2088_v32 = vsub.f32 %v3912_v61, %v2060_v22  ;;  %2832 = vlog2.f32 %v2042_v29 }
 0xc25   :  { %v2823_v62 = vpop.eup %2822  ;;  %v2085_v1 = vsub.f32 %v3908_v59, %v2054_v27 }
 0xc26   :  { %v2825_v46 = vpop.eup %2824  ;;  %2104 = vst [vmem:[#allocation13 + $0x18] sm:$0xff] %v2088_v32  ;;  %v2056_v23 = vmul.f32 0.6931472, %v2823_v62  ;;  %v2044_v3 = vpop.xlane.xlu1 %2043 }
 0xc27   :  { %2101 = vst [vmem:[#allocation13] sm:$0xff] %v2085_v1  ;;  %v2066_v14 = vmul.f32 0.6931472, %v2825_v46  ;;  %2834 = vlog2.f32 %v2044_v3  ;;  %v2038_v63 = vpop.xlane.xlu0 %2037 }
 0xc28   :  { %v2086_v44 = vsub.f32 %v3914_v9, %v2056_v23  ;;  %2836 = vlog2.f32 %v2038_v63 }
 0xc29   :  { %v2827_v5 = vpop.eup %2826  ;;  %v2091_v52 = vsub.f32 %v3918_v16, %v2066_v14 }
 0xc2a   :  { %v2829_v37 = vpop.eup %2828  ;;  %2102 = vst [vmem:[#allocation13 + $0x8] sm:$0xff] %v2086_v44  ;;  %v2068_v61 = vmul.f32 0.6931472, %v2827_v5  ;;  %v2040_v11 = vpop.xlane.xlu1 %2039 }
 0xc2b   :  { %2107 = vst [vmem:[#allocation13 + $0x30] sm:$0xff] %v2091_v52  ;;  %v2062_v59 = vmul.f32 0.6931472, %v2829_v37  ;;  %2838 = vlog2.f32 %v2040_v11  ;;  %v2046_v35 = vpop.xlane.xlu0 %2045 }
 0xc2c   :  { %v2092_v26 = vsub.f32 %v3920_v42, %v2068_v61  ;;  %2840 = vlog2.f32 %v2046_v35 }
 0xc2d   :  { %v2831_v30 = vpop.eup %2830  ;;  %v2089_v24 = vsub.f32 %v3924_v48, %v2062_v59 }
 0xc2e   :  { %v2833_v4 = vpop.eup %2832  ;;  %2108 = vst [vmem:[#allocation13 + $0x38] sm:$0xff] %v2092_v26  ;;  %v2064_v9 = vmul.f32 0.6931472, %v2831_v30  ;;  %v2048_v12 = vpop.xlane.xlu1 %2047 }
 0xc2f   :  { %2105 = vst [vmem:[#allocation13 + $0x20] sm:$0xff] %v2089_v24  ;;  %v2074_v16 = vmul.f32 0.6931472, %v2833_v4  ;;  %2842 = vlog2.f32 %v2048_v12  ;;  %v2050_v13 = vpop.xlane.xlu0 %2049 }
 0xc30   :  { %v2090_v8 = vsub.f32 %v3926_v57, %v2064_v9  ;;  %2844 = vlog2.f32 %v2050_v13 }
 0xc31   :  { %v2835_v15 = vpop.eup %2834  ;;  %v2095_v60 = vsub.f32 %v3930_v2, %v2074_v16 }
 0xc32   :  { %v2837_v47 = vpop.eup %2836  ;;  %2106 = vst [vmem:[#allocation13 + $0x28] sm:$0xff] %v2090_v8  ;;  %v2076_v42 = vmul.f32 0.6931472, %v2835_v15  ;;  %v2052_v0 = vpop.xlane.xlu1 %2051 }
 0xc33   :  { %2111 = vst [vmem:[#allocation13 + $0x50] sm:$0xff] %v2095_v60  ;;  %v2070_v48 = vmul.f32 0.6931472, %v2837_v47  ;;  %2846 = vlog2.f32 %v2052_v0 }
 0xc34   :  { %v2096_v17 = vsub.f32 %v3932_v21, %v2076_v42 }
 0xc35   :  { %v2839_v31 = vpop.eup %2838  ;;  %v2093_v39 = vsub.f32 %v3936_v50, %v2070_v48 }
 0xc36   :  { %v2841_v36 = vpop.eup %2840  ;;  %2112 = vst [vmem:[#allocation13 + $0x58] sm:$0xff] %v2096_v17  ;;  %v2072_v38 = vmul.f32 0.6931472, %v2839_v31 }
 0xc37   :  { %2109 = vst [vmem:[#allocation13 + $0x40] sm:$0xff] %v2093_v39  ;;  %v2078_v57 = vmul.f32 0.6931472, %v2841_v36 }
 0xc38   :  { %v2094_v49 = vsub.f32 %v3939_v28, %v2072_v38 }
 0xc39   :  { %v2843_v2 = vpop.eup %2842  ;;  %v2097_v25 = vsub.f32 %v3944_v34, %v2078_v57 }
 0xc3a   :  { %v2845_v6 = vpop.eup %2844  ;;  %2110 = vst [vmem:[#allocation13 + $0x48] sm:$0xff] %v2094_v49  ;;  %v2080_v19 = vmul.f32 0.6931472, %v2843_v2 }
 0xc3b   :  { %2113 = vst [vmem:[#allocation13 + $0x60] sm:$0xff] %v2097_v25  ;;  %v2082_v53 = vmul.f32 0.6931472, %v2845_v6 }
 0xc3c   :  { %v2098_v21 = vsub.f32 %v3948_v58, %v2080_v19 }
 0xc3d   :  { %v2847_v41 = vpop.eup %2846  ;;  %v2099_v50 = vsub.f32 %v3952_v55, %v2082_v53 }
 0xc3e   :  { %2114 = vst [vmem:[#allocation13 + $0x68] sm:$0xff] %v2098_v21  ;;  %v2084_v10 = vmul.f32 0.6931472, %v2847_v41 }
 0xc3f   :  { %2115 = vst [vmem:[#allocation13 + $0x70] sm:$0xff] %v2099_v50 }
 0xc40   :  { %v2100_v28 = vsub.f32 %v3956_v56, %v2084_v10 }
 0xc42   :  { %2116 = vst [vmem:[#allocation13 + $0x78] sm:$0xff] %v2100_v28 }
 0xc43   :  { %2987 = shalt.err (!%p2984_p5)
}
 0xc44   :  { %s2988_s29 = scalar_lea.hbm %s3996_s9, 2048 }
 0xc45   :  { %p2989_p6 = scmp.ne.s32.totalorder %s3996_s9, %s2988_s29  ;;  %p2992_p7 = scmp.lt.u32.totalorder %s2988_s29, %s3996_s9 }
 0xc47   :  { %p2994_p8 = pnand %p2992_p7, %p2989_p6 }
 0xc49   :  { %2997 = shalt.err (!%p2994_p8)
}
 0xc4a   :  { %s3017_s10 = smov 128   ;;  %s3018_s0 = smov 8  }
 0xc4b   :  { %2128 = dma.vmem_to_hbm [thread:$0]  %s2123_s5, 2048, %s3996_s9, [#allocation4], %s3017_s10, %s3017_s10, %s3018_s0  }
 0xc4c   :  { %3006 = dma.done.wait [#allocation4], 2048  }
 0xc4d   :  { %3007 = vsyncadd [#allocation4], 4294965248 }
 0xc4e   :  { %2132 = vsyncpa [#allocation3], 1 }
 0xc4f   :  { %2133 = vsyncpa [#allocation8], 1 }
 0xc50   :  { %2134 = vsyncpa [#allocation11], 1 }
 0xc51   :  { %2135 = vsyncpa [#allocation4], 1 }
 0xc52   :  { %2136 = vsyncpa [#allocation5], 1 }

</bundles_post_ra>
